<compile_context>
chip_gen: v6e
topology: v6e:2x2x1
jax: 0.10.0
libtpu: 0.0.40
codegen_flags: <defaults>
</compile_context>

<pallas_src>
import functools

import jax
import jax.numpy as jnp
from jax import lax
from jax.experimental import pallas as pl
from jax.experimental.pallas import tpu as pltpu


def _self_attn_kernel(x_ref, w_ref, gamma_ref, o_ref, *, cqp, c, n, nb, exp_in_bf16):
    """Whole (small) batch handled in a single invocation.

    x_ref     : (C + 8, B*N)          f32   rows [x; ones; zeros_7], batch on lanes
    w_ref     : (2*cqp + c + 1, C+8)  bf16  fused [Wq|bq; Wk|bk; Wv|bv; ones-row]
    gamma_ref : (1,)                  f32   scalar in SMEM
    o_ref     : (B, C, N)             f32
    """
    x_aug = x_ref[...]                                    # (C+8, B*N) f32
    xb = x_aug.astype(jnp.bfloat16)

    # One fused Q/K/V (+ denominator-row) projection over all batches' lanes.
    # Bias is folded in via the ones row of x_aug / bias column of w_ref.
    qkv = jnp.dot(w_ref[...], xb, preferred_element_type=jnp.float32)   # (R, B*N) f32

    gamma = gamma_ref[0]

    # Per-batch attention; B is tiny, so a statically unrolled loop keeps every
    # slice start static and tile-aligned (no dynamic-slice relayouts).
    for b in range(nb):
        s = b * n
        q = qkv[0:cqp, s:s + n].astype(jnp.bfloat16)                  # (Cqp, N); pad rows == 0
        k = qkv[cqp:2 * cqp, s:s + n].astype(jnp.bfloat16)            # (Cqp, N)
        v_aug = qkv[2 * cqp:2 * cqp + c + 1, s:s + n].astype(jnp.bfloat16)  # (C+1, N); last row == 1

        # energy_t[j, i] = sum_c k[c, j] * q[c, i]  (keys on sublanes, queries on lanes).
        energy_t = lax.dot_general(k, q, (((0,), (0,)), ((), ())),
                                   preferred_element_type=jnp.float32)      # (Nk, Nq) f32

        # Numerically-stable, UN-normalized softmax over keys (axis 0);
        # normalization is deferred to the epilogue via the ones-row denominator.
        m = jnp.max(energy_t, axis=0, keepdims=True)                         # (1, Nq)
        if exp_in_bf16:
            # bf16 EUP (v6e/v7x): halves EUP pushes and skips the f32->bf16 copy.
            p_t = jnp.exp((energy_t - m).astype(jnp.bfloat16))               # (Nk, Nq) bf16
        else:
            p_t = jnp.exp(energy_t - m).astype(jnp.bfloat16)                 # v5e: f32 EUP

        # out_aug[c, i] = sum_j v_aug[c, j] * p_t[j, i] -- canonical (M,K)x(K,N):
        # no N x N transpose of p_t.  Last row == softmax row-sums l[i].
        out_aug = lax.dot_general(v_aug, p_t, (((1,), (0,)), ((), ())),
                                  preferred_element_type=jnp.float32)        # (C+1, Nq) f32

        inv_l = pl.reciprocal(out_aug[c:c + 1, :], approx=True)              # (1, Nq), EUP slot
        attn_out = out_aug[0:c, :] * inv_l                                    # (C, Nq)

        o_ref[b] = (gamma * attn_out + x_aug[0:c, s:s + n]).astype(o_ref.dtype)


def self_attention_pallas(x, wq, bq, wk, bk, wv, bv, gamma, *, exp_in_bf16=None):
    """x: (B, C, W, H) float32 (NCHW); weights/biases as in the PyTorch module (1x1 convs)."""
    B, C, W, H = x.shape
    N = W * H
    Cq = wq.shape[0]
    # TODO(synk): pad N to a multiple of 128 (with -inf key masking) for non-aligned W*H.
    assert N % 128 == 0, "W*H must be a multiple of 128 for this kernel"

    if exp_in_bf16 is None:
        kind = jax.devices()[0].device_kind.lower()
        # bf16 EUP exists on v6e / v7x; keep f32 exp elsewhere (v5e has no bf16 EUP).
        exp_in_bf16 = ("v6" in kind) or ("v7" in kind)

    # Pad Cq up to a multiple of 8 sublanes so in-kernel row slices stay
    # tile-aligned; zero weight rows contribute exactly 0 to the energy.
    Cqp = max(8, ((Cq + 7) // 8) * 8)
    Ca = C + 8            # contraction dim padded with [ones; zeros_7] for the bias fold

    def fuse(w, b, rows):
        # [W | b | 0_7] padded to `rows` output rows.
        wb = jnp.concatenate([w, b, jnp.zeros((w.shape[0], 7), w.dtype)], axis=1)  # (r, C+8)
        return jnp.pad(wb, ((0, rows - w.shape[0]), (0, 0)))

    # The ones-row weight picks out the ones row of x_aug -> projection row of 1s,
    # whose PV contraction is the softmax denominator.
    ones_row = jnp.zeros((1, Ca), wv.dtype).at[0, C].set(1.0)
    w_aug = jnp.concatenate([fuse(wq, bq, Cqp), fuse(wk, bk, Cqp),
                             fuse(wv, bv, C), ones_row], axis=0).astype(jnp.bfloat16)
    R = 2 * Cqp + C + 1

    # x laid out (C, B*N) so the projection is a single matmul over all batches'
    # lanes, augmented with the tile-aligned [ones; zeros_7] block for the bias fold.
    x2 = jnp.transpose(x.reshape(B, C, N), (1, 0, 2)).reshape(C, B * N)
    x_aug = jnp.concatenate(
        [x2, jnp.ones((1, B * N), x.dtype), jnp.zeros((7, B * N), x.dtype)], axis=0)  # (C+8, B*N)

    kernel = functools.partial(_self_attn_kernel, cqp=Cqp, c=C, n=N, nb=B,
                               exp_in_bf16=exp_in_bf16)
    out = pl.pallas_call(
        kernel,
        out_shape=jax.ShapeDtypeStruct((B, C, N), x.dtype),
        grid=(1,),
        in_specs=[
            pl.BlockSpec((Ca, B * N), lambda i: (0, 0)),     # x_aug (f32)
            pl.BlockSpec((R, Ca), lambda i: (0, 0)),         # fused weights (bf16)
            pl.BlockSpec(memory_space=pltpu.SMEM),           # gamma scalar
        ],
        out_specs=pl.BlockSpec((B, C, N), lambda i: (0, 0, 0)),
        compiler_params=pltpu.CompilerParams(
            dimension_semantics=("arbitrary",)),
    )(x_aug, w_aug, gamma)

    return out.reshape(B, C, W, H)


def self_attention_ref(x, wq, bq, wk, bk, wv, bv, gamma):
    """Pure-JAX f32 reference mirroring the PyTorch forward."""
    B, C, W, H = x.shape
    N = W * H
    x2 = x.reshape(B, C, N)
    q = jnp.einsum('oc,bcn->bon', wq, x2) + bq[None, :, :]      # (B, Cq, N)
    k = jnp.einsum('oc,bcn->bon', wk, x2) + bk[None, :, :]      # (B, Cq, N)
    v = jnp.einsum('oc,bcn->bon', wv, x2) + bv[None, :, :]      # (B, C , N)
    energy = jnp.einsum('bci,bcj->bij', q, k)                   # (B, N, N)
    attn = jax.nn.softmax(energy, axis=-1)
    out = jnp.einsum('bcj,bij->bci', v, attn)                   # (B, C, N)
    y = gamma[0] * out + x2
    return y.reshape(B, C, W, H)


if __name__ == "__main__":
    B, C, W, H = 2, 32, 16, 16
    Cq = C // 8

    key = jax.random.PRNGKey(0)
    kx, k1, k2, k3, k4, k5, k6 = jax.random.split(key, 7)

    x = jax.random.normal(kx, (B, C, W, H), dtype=jnp.float32)

    # Conv2d(k=1) weights (out, in); biases kept as (out, 1).
    wq = jax.random.normal(k1, (Cq, C), dtype=jnp.float32) * 0.1
    bq = jax.random.normal(k2, (Cq, 1), dtype=jnp.float32) * 0.1
    wk = jax.random.normal(k3, (Cq, C), dtype=jnp.float32) * 0.1
    bk = jax.random.normal(k4, (Cq, 1), dtype=jnp.float32) * 0.1
    wv = jax.random.normal(k5, (C, C), dtype=jnp.float32) * 0.1
    bv = jax.random.normal(k6, (C, 1), dtype=jnp.float32) * 0.1
    # PyTorch inits gamma to 0 (which would make out == x); use a nonzero value
    # deterministically so the attention path is actually exercised.
    gamma = jnp.array([0.5], dtype=jnp.float32)

    y = self_attention_pallas(x, wq, bq, wk, bk, wv, bv, gamma)
    y = jax.block_until_ready(y)

    y_ref = self_attention_ref(x, wq, bq, wk, bk, wv, bv, gamma)
    assert y.shape == (B, C, W, H)
    # bf16 MXU operands (+ bf16 exp on v6e/v7x) and approx reciprocal loosen
    # agreement vs. the f32 reference; ~1e-2-level is expected and accepted.
    assert jnp.allclose(y, y_ref, atol=2e-2, rtol=2e-2), "mismatch vs JAX reference"

    print("KERNEL_OK")
</pallas_src>

<mosaic_0001>
module attributes {stable_mosaic.version = 11 : i64} {
  func.func @_self_attn_kernel(%arg0: i32, %arg1: memref<40x512xf32, #tpu.memory_space<vmem>>, %arg2: memref<49x40xbf16, #tpu.memory_space<vmem>>, %arg3: memref<1xf32, #tpu.memory_space<smem>>, %arg4: memref<2x32x256xf32, #tpu.memory_space<vmem>>) attributes {dimension_semantics = [#tpu.dimension_semantics<arbitrary>], iteration_bounds = array<i64: 1>, scalar_prefetch = 0 : i64, scratch_operands = 0 : i64, tpu.core_type = #tpu.core_type<tc>, window_params = [{pipeline_mode = #tpu.pipeline_mode<synchronous>, transform_indices = @transform_0, window_bounds = array<i64: 40, 512>}, {pipeline_mode = #tpu.pipeline_mode<synchronous>, transform_indices = @transform_1, window_bounds = array<i64: 49, 40>}, {transform_indices = @transform_2, window_bounds = array<i64: 1>}, {pipeline_mode = #tpu.pipeline_mode<synchronous>, transform_indices = @transform_3, window_bounds = array<i64: 2, 32, 256>}]} {
    %c0 = arith.constant 0 : index
    %c0_0 = arith.constant 0 : index
    %0 = vector.load %arg1[%c0, %c0_0] : memref<40x512xf32, #tpu.memory_space<vmem>>, vector<40x512xf32>
    %1 = arith.truncf %0 : vector<40x512xf32> to vector<40x512xbf16>
    %c0_1 = arith.constant 0 : index
    %c0_2 = arith.constant 0 : index
    %2 = vector.load %arg2[%c0_1, %c0_2] : memref<49x40xbf16, #tpu.memory_space<vmem>>, vector<49x40xbf16>
    %cst = arith.constant dense<0.000000e+00> : vector<49x512xf32>
    %3 = tpu.matmul %2, %1, %cst {dimension_numbers = #tpu.dot_dimension_numbers<[1], [0], [0], [1], [0, 0, 1, 1], [], []>} : vector<49x40xbf16>, vector<40x512xbf16>, vector<49x512xf32> -> vector<49x512xf32>
    %c0_3 = arith.constant 0 : index
    %4 = memref.load %arg3[%c0_3] : memref<1xf32, #tpu.memory_space<smem>>
    %5 = vector.extract_strided_slice %3 {offsets = [0, 0], sizes = [8, 256], strides = [1, 1]} : vector<49x512xf32> to vector<8x256xf32>
    %6 = arith.truncf %5 : vector<8x256xf32> to vector<8x256xbf16>
    %7 = vector.extract_strided_slice %3 {offsets = [8, 0], sizes = [8, 256], strides = [1, 1]} : vector<49x512xf32> to vector<8x256xf32>
    %8 = arith.truncf %7 : vector<8x256xf32> to vector<8x256xbf16>
    %9 = vector.extract_strided_slice %3 {offsets = [16, 0], sizes = [33, 256], strides = [1, 1]} : vector<49x512xf32> to vector<33x256xf32>
    %10 = arith.truncf %9 : vector<33x256xf32> to vector<33x256xbf16>
    %cst_4 = arith.constant dense<0.000000e+00> : vector<256x256xf32>
    %11 = tpu.matmul %8, %6, %cst_4 {dimension_numbers = #tpu.dot_dimension_numbers<[0], [0], [1], [1], [0, 1, 1, 1], [], []>} : vector<8x256xbf16>, vector<8x256xbf16>, vector<256x256xf32> -> vector<256x256xf32>
    %cst_5 = arith.constant dense<0xFF800000> : vector<256xf32>
    %12 = vector.multi_reduction <maximumf>, %11, %cst_5 [0] : vector<256x256xf32> to vector<256xf32>
    %13 = vector.shape_cast %12 : vector<256xf32> to vector<1x256xf32>
    %14 = vector.broadcast %13 : vector<1x256xf32> to vector<256x256xf32>
    %15 = arith.subf %11, %14 : vector<256x256xf32>
    %16 = math.exp %15 : vector<256x256xf32>
    %17 = arith.truncf %16 : vector<256x256xf32> to vector<256x256xbf16>
    %cst_6 = arith.constant dense<0.000000e+00> : vector<33x256xf32>
    %18 = tpu.matmul %10, %17, %cst_6 {dimension_numbers = #tpu.dot_dimension_numbers<[1], [0], [0], [1], [0, 0, 1, 1], [], []>} : vector<33x256xbf16>, vector<256x256xbf16>, vector<33x256xf32> -> vector<33x256xf32>
    %19 = vector.extract_strided_slice %18 {offsets = [32, 0], sizes = [1, 256], strides = [1, 1]} : vector<33x256xf32> to vector<1x256xf32>
    %20 = tpu.reciprocal %19 {approx = true} : vector<1x256xf32> -> vector<1x256xf32>
    %21 = vector.extract_strided_slice %18 {offsets = [0, 0], sizes = [32, 256], strides = [1, 1]} : vector<33x256xf32> to vector<32x256xf32>
    %22 = vector.broadcast %20 : vector<1x256xf32> to vector<32x256xf32>
    %23 = arith.mulf %21, %22 : vector<32x256xf32>
    %24 = vector.broadcast %4 : f32 to vector<32x256xf32>
    %25 = arith.mulf %24, %23 : vector<32x256xf32>
    %26 = vector.extract_strided_slice %0 {offsets = [0, 0], sizes = [32, 256], strides = [1, 1]} : vector<40x512xf32> to vector<32x256xf32>
    %27 = arith.addf %25, %26 : vector<32x256xf32>
    %c0_7 = arith.constant 0 : index
    %c0_8 = arith.constant 0 : index
    %c0_9 = arith.constant 0 : index
    %28 = vector.load %arg4[%c0_7, %c0_8, %c0_9] : memref<2x32x256xf32, #tpu.memory_space<vmem>>, vector<1x32x256xf32>
    %29 = vector.shape_cast %28 : vector<1x32x256xf32> to vector<32x256xf32>
    %30 = vector.shape_cast %27 : vector<32x256xf32> to vector<1x32x256xf32>
    tpu.vector_store %arg4[%c0_7, %c0_8, %c0_9], %30 {strides = array<i32>} : memref<2x32x256xf32, #tpu.memory_space<vmem>>, vector<1x32x256xf32>,
    %31 = vector.extract_strided_slice %3 {offsets = [0, 256], sizes = [8, 256], strides = [1, 1]} : vector<49x512xf32> to vector<8x256xf32>
    %32 = arith.truncf %31 : vector<8x256xf32> to vector<8x256xbf16>
    %33 = vector.extract_strided_slice %3 {offsets = [8, 256], sizes = [8, 256], strides = [1, 1]} : vector<49x512xf32> to vector<8x256xf32>
    %34 = arith.truncf %33 : vector<8x256xf32> to vector<8x256xbf16>
    %35 = vector.extract_strided_slice %3 {offsets = [16, 256], sizes = [33, 256], strides = [1, 1]} : vector<49x512xf32> to vector<33x256xf32>
    %36 = arith.truncf %35 : vector<33x256xf32> to vector<33x256xbf16>
    %cst_10 = arith.constant dense<0.000000e+00> : vector<256x256xf32>
    %37 = tpu.matmul %34, %32, %cst_10 {dimension_numbers = #tpu.dot_dimension_numbers<[0], [0], [1], [1], [0, 1, 1, 1], [], []>} : vector<8x256xbf16>, vector<8x256xbf16>, vector<256x256xf32> -> vector<256x256xf32>
    %cst_11 = arith.constant dense<0xFF800000> : vector<256xf32>
    %38 = vector.multi_reduction <maximumf>, %37, %cst_11 [0] : vector<256x256xf32> to vector<256xf32>
    %39 = vector.shape_cast %38 : vector<256xf32> to vector<1x256xf32>
    %40 = vector.broadcast %39 : vector<1x256xf32> to vector<256x256xf32>
    %41 = arith.subf %37, %40 : vector<256x256xf32>
    %42 = math.exp %41 : vector<256x256xf32>
    %43 = arith.truncf %42 : vector<256x256xf32> to vector<256x256xbf16>
    %cst_12 = arith.constant dense<0.000000e+00> : vector<33x256xf32>
    %44 = tpu.matmul %36, %43, %cst_12 {dimension_numbers = #tpu.dot_dimension_numbers<[1], [0], [0], [1], [0, 0, 1, 1], [], []>} : vector<33x256xbf16>, vector<256x256xbf16>, vector<33x256xf32> -> vector<33x256xf32>
    %45 = vector.extract_strided_slice %44 {offsets = [32, 0], sizes = [1, 256], strides = [1, 1]} : vector<33x256xf32> to vector<1x256xf32>
    %46 = tpu.reciprocal %45 {approx = true} : vector<1x256xf32> -> vector<1x256xf32>
    %47 = vector.extract_strided_slice %44 {offsets = [0, 0], sizes = [32, 256], strides = [1, 1]} : vector<33x256xf32> to vector<32x256xf32>
    %48 = vector.broadcast %46 : vector<1x256xf32> to vector<32x256xf32>
    %49 = arith.mulf %47, %48 : vector<32x256xf32>
    %50 = vector.broadcast %4 : f32 to vector<32x256xf32>
    %51 = arith.mulf %50, %49 : vector<32x256xf32>
    %52 = vector.extract_strided_slice %0 {offsets = [0, 256], sizes = [32, 256], strides = [1, 1]} : vector<40x512xf32> to vector<32x256xf32>
    %53 = arith.addf %51, %52 : vector<32x256xf32>
    %c1 = arith.constant 1 : index
    %c0_13 = arith.constant 0 : index
    %c0_14 = arith.constant 0 : index
    %54 = vector.load %arg4[%c1, %c0_13, %c0_14] : memref<2x32x256xf32, #tpu.memory_space<vmem>>, vector<1x32x256xf32>
    %55 = vector.shape_cast %54 : vector<1x32x256xf32> to vector<32x256xf32>
    %56 = vector.shape_cast %53 : vector<32x256xf32> to vector<1x32x256xf32>
    tpu.vector_store %arg4[%c1, %c0_13, %c0_14], %56 {strides = array<i32>} : memref<2x32x256xf32, #tpu.memory_space<vmem>>, vector<1x32x256xf32>,
    return
  }
  func.func @transform_0(%arg0: i32) -> (i32, i32) {
    %c0_i32 = arith.constant 0 : i32
    %c0_i32_0 = arith.constant 0 : i32
    %c0_i32_1 = arith.constant 0 : i32
    return %c0_i32, %c0_i32_0 : i32, i32
  }
  func.func @transform_1(%arg0: i32) -> (i32, i32) {
    %c0_i32 = arith.constant 0 : i32
    %c0_i32_0 = arith.constant 0 : i32
    %c0_i32_1 = arith.constant 0 : i32
    return %c0_i32, %c0_i32_0 : i32, i32
  }
  func.func @transform_2(%arg0: i32) -> i32 {
    %c0_i32 = arith.constant 0 : i32
    %c0_i32_0 = arith.constant 0 : i32
    return %c0_i32 : i32
  }
  func.func @transform_3(%arg0: i32) -> (i32, i32, i32) {
    %c0_i32 = arith.constant 0 : i32
    %c0_i32_0 = arith.constant 0 : i32
    %c0_i32_1 = arith.constant 0 : i32
    %c0_i32_2 = arith.constant 0 : i32
    return %c0_i32, %c0_i32_0, %c0_i32_1 : i32, i32, i32
  }
}

</mosaic_0001>

<bundles_post_ra>
// kernel: tpu_custom_call.1
= control target key start
LH: loop header
LB: loop body
LE: loop exit
PB: predicated region body
PF: predicated region fallthrough
CT: control target
= control target key end

     0   :  { %9 = vsyncpa [#allocation4], 0  ;;  %s3058_s0 = inlined_call_operand.hbm [shape: f32[40,512], index: 0, kind: input, shape index: {}]   ;;  %s3059_s1 = inlined_call_operand.vmem [shape: bf16[49,40], index: 1, kind: input, shape index: {}]   ;;  %s3060_s2 = inlined_call_operand.<no memory space> [shape: f32[1], index: 2, kind: input, shape index: {}]   ;;  %s3061_s3 = inlined_call_operand.hbm [shape: f32[2,32,256], index: 3, kind: output, shape index: {}]  }
   0x1   :  { %10 = vsyncpa [#allocation5], 0  ;;  %s2040_s12 = smov [#allocation3]  }
   0x2   :  { %s16_s13 = sshll.u32 %s2040_s12, 4  ;;  %s17_s13 = int_to_ptr.vmem [resolvable:$true] %s16_s13 }
   0x3   :  { %s2004_s14 = scalar_lea.vmem %s17_s13, 2560  ;;  %p2009_p1 = scmp.lt.s32.totalorder %s17_s13, %s17_s13 }
   0x4   :  { %p2005_p0 = scmp.ne.s32.totalorder %s17_s13, %s2004_s14  ;;  %p2010_p2 = scmp.lt.s32.totalorder %s2004_s14, %s2004_s14 }
   0x6   :  { %p2011_p3 = por %p2010_p2, %p2009_p1 }
   0x8   :  { %p2012_p4 = pnand %p2011_p3, %p2005_p0 }
   0xa   :  { %2015 = shalt.err (!%p2012_p4)
}
   0xb   :  { %s2041_s15 = smov 512   ;;  %s2042_s16 = smov 32  }
   0xc   :  { %22 = dma.hbm_to_vmem [thread:$0]  %s3058_s0, 2560, %s17_s13, [#allocation4], %s2041_s15, %s2041_s15, %s2042_s16  }
   0xd   :  { %2036 = dma.done.wait [#allocation4], 2560  }
   0xe   :  { %2037 = vsyncadd [#allocation4], 4294964736  ;;  %v3062_v0 = vmov 0   ;;  %v48_v1 = vld [vmem:[#allocation3 + $0x88] sm:$0xff]  ;;  %vm101_vm0 = vcmask 1043456   ;;  %v47_v2 = vld [vmem:[#allocation3 + $0x80] sm:$0xff] }
   0xf   :  { %146 = vmatprep.mubr.bf16.mxu0 %v3062_v0  ;;  %217 = vmatprep.mubr.bf16.mxu1 %v3062_v0  ;;  %v40_v3 = vld [vmem:[#allocation3 + $0x48] sm:$0xff]  ;;  %v60_v4 = vpack.c.bf16 %v48_v1, %v48_v1  ;;  %v59_v5 = vpack.c.bf16 %v47_v2, %v47_v2  ;;  %v39_v7 = vld [vmem:[#allocation3 + $0x40] sm:$0xff]  ;;  %vm88_vm1 = vcmask 326656   ;;  %v1714_v20 = vld [vmem:[%s3059_s1 + $0x10] sm:$0xff]   ;;  %vm299_vm2 = vcmask 64512  }
  0x10   :  { %v44_v6 = vld [vmem:[#allocation3 + $0x68] sm:$0xff]  ;;  %v43_v8 = vld [vmem:[#allocation3 + $0x60] sm:$0xff]  ;;  %v1715_v21 = vld [vmem:[%s3059_s1 + $0x18] ss:$0 sps:$4 sm:$0x11]  }
  0x11   :  { %v56_v9 = vpack.c.bf16 %v44_v6, %v40_v3  ;;  %v32_v10 = vld [vmem:[#allocation3 + $0x8] sm:$0xff]  ;;  %1661 = vmatprep.subr.msk.bf16.mxu0 %vm101_vm0, %v60_v4  ;;  %v103_v12 = vsel %vm101_vm0, %v59_v5, 0  ;;  %v31_v13 = vld [vmem:[#allocation3] sm:$0xff]  ;;  %v55_v14 = vpack.c.bf16 %v43_v8, %v39_v7  ;;  %v50_v31 = vld [vmem:[#allocation3 + $0x98] sm:$0xff] }
  0x12   :  { %v36_v11 = vld [vmem:[#allocation3 + $0x28] sm:$0xff]  ;;  %125 = vmatpush1.bf16.msra.mxu0 %v103_v12  ;;  %v35_v15 = vld [vmem:[#allocation3 + $0x20] sm:$0xff]  ;;  %v49_v32 = vld [vmem:[#allocation3 + $0x90] sm:$0xff]  ;;  %v62_v33 = vpack.c.bf16 %v50_v31, %v50_v31 }
  0x13   :  { %126 = vmatprep.subr.bf16.mxu0 %v56_v9  ;;  %v52_v16 = vpack.c.bf16 %v36_v11, %v32_v10  ;;  %v51_v17 = vpack.c.bf16 %v35_v15, %v31_v13  ;;  %v1712_v18 = vld [vmem:[%s3059_s1] sm:$0xff]   ;;  %v1713_v19 = vld [vmem:[%s3059_s1 + $0x8] sm:$0xff]   ;;  %v61_v34 = vpack.c.bf16 %v49_v32, %v49_v32  ;;  %v42_v35 = vld [vmem:[#allocation3 + $0x58] sm:$0xff] }
  0x14   :  { %v46_v36 = vld [vmem:[#allocation3 + $0x78] sm:$0xff]  ;;  %1666 = vmatprep.subr.msk.bf16.mxu1 %vm101_vm0, %v62_v33  ;;  %v41_v39 = vld [vmem:[#allocation3 + $0x50] sm:$0xff] }
  0x15   :  { %v58_v37 = vpack.c.bf16 %v46_v36, %v42_v35  ;;  %v109_v38 = vsel %vm101_vm0, %v61_v34, 0  ;;  %v45_v40 = vld [vmem:[#allocation3 + $0x70] sm:$0xff]  ;;  %v34_v42 = vld [vmem:[#allocation3 + $0x18] sm:$0xff] }
  0x16   :  { %127 = vmatpush1.bf16.msra.mxu0 %v55_v14  ;;  %196 = vmatpush1.bf16.msra.mxu1 %v109_v38  ;;  %v57_v41 = vpack.c.bf16 %v45_v40, %v41_v39  ;;  %v38_v43 = vld [vmem:[#allocation3 + $0x38] sm:$0xff]  ;;  %v33_v44 = vld [vmem:[#allocation3 + $0x10] sm:$0xff] }
  0x17   :  { %128 = vmatprep.subr.bf16.mxu0 %v52_v16  ;;  %197 = vmatprep.subr.bf16.mxu1 %v58_v37  ;;  %v54_v45 = vpack.c.bf16 %v38_v43, %v34_v42  ;;  %v37_v46 = vld [vmem:[#allocation3 + $0x30] sm:$0xff] }
  0x18   :  { %v53_v47 = vpack.c.bf16 %v37_v46, %v33_v44 }
  0x1a   :  { %129 = vmatpush1.bf16.msra.mxu0 %v51_v17  ;;  %198 = vmatpush1.bf16.msra.mxu1 %v57_v41 }
  0x1b   :  { %199 = vmatprep.subr.bf16.mxu1 %v54_v45 }
  0x1d   :  { %1662 = vmatmul.mubr.msk.bf16.vlgmr.msra.gmra.mxu0 %vm88_vm1, %v1712_v18 }
  0x1e   :  { %156 = vmatprep.mubr.bf16.mxu0 %v3062_v0  ;;  %200 = vmatpush1.bf16.msra.mxu1 %v53_v47 }
  0x21   :  { %1667 = vmatmul.mubr.msk.bf16.vlgmr.msra.gmra.mxu1 %vm88_vm1, %v1712_v18 }
  0x22   :  { %227 = vmatprep.mubr.bf16.mxu1 %v3062_v0 }
  0x25   :  { %1663 = vmatmul.mubr.msk.bf16.gmra.mxu0 %vm88_vm1, %v1713_v19 }
  0x26   :  { %166 = vmatprep.mubr.bf16.mxu0 %v3062_v0 }
  0x29   :  { %1668 = vmatmul.mubr.msk.bf16.gmra.mxu1 %vm88_vm1, %v1713_v19 }
  0x2a   :  { %237 = vmatprep.mubr.bf16.mxu1 %v3062_v0 }
  0x2d   :  { %1664 = vmatmul.mubr.msk.bf16.gmra.mxu0 %vm88_vm1, %v1714_v20 }
  0x2e   :  { %176 = vmatprep.mubr.bf16.mxu0 %v3062_v0 }
  0x31   :  { %1669 = vmatmul.mubr.msk.bf16.gmra.mxu1 %vm88_vm1, %v1714_v20 }
  0x32   :  { %247 = vmatprep.mubr.bf16.mxu1 %v3062_v0 }
  0x35   :  { %1665 = vmatmul.mubr.msk.bf16.gmra.mxu0 %vm88_vm1, %v1715_v21 }
  0x36   :  { %386 = vmatprep.mubr.bf16.mxu0 %v3062_v0 }
  0x39   :  { %1670 = vmatmul.mubr.msk.bf16.gmra.mxu1 %vm88_vm1, %v1715_v21 }
  0xdd   :  { %v148_v22 = vpop.f32.mrf.mxu0 }
  0xde   :  { %v257_v23 = vpack.c.bf16 %v148_v22, %v148_v22 }
  0xdf   :  { %v150_v24 = vpop.f32.mrf.mxu0 }
  0xe0   :  { %v258_v25 = vpack.c.bf16 %v150_v24, %v150_v24  ;;  %v349_v27 = vsel %vm101_vm0, %v257_v23, 0 }
  0xe1   :  { %v152_v26 = vpop.f32.mrf.mxu0  ;;  %v2158_v17 = vpop.f32.mrf.mxu1 }
  0xe2   :  { %1671 = vmatprep.subr.msk.bf16.mxu0 %vm101_vm0, %v258_v25  ;;  %v259_v28 = vpack.c.bf16 %v152_v26, %v152_v26  ;;  %3125 = vst [vmem:[#allocation17_spill] sm:$0xff] %v2158_v17 }
  0xe3   :  { %369 = vmatpush1.bf16.msra.mxu0 %v349_v27  ;;  %v154_v29 = vpop.f32.mrf.mxu0  ;;  %v2160_v18 = vpop.f32.mrf.mxu1 }
  0xe4   :  { %267 = vxpose.xlu0.c.b16.start.end [1/1] (short) %v259_v28, 128  ;;  %v260_v30 = vpack.c.bf16 %v154_v29, %v154_v29  ;;  %3126 = vst [vmem:[#allocation18_spill] sm:$0xff] %v2160_v18 }
  0xe5   :  { %v2102_v48 = vpop.f32.mrf.mxu0  ;;  %v223_v19 = vpop.f32.mrf.mxu1 }
  0xe6   :  { %3117 = vst [vmem:[#allocation9_spill] sm:$0xff] %v2102_v48  ;;  %v951_v20 = vpack.c.bf16 %v223_v19, %v223_v19 }
  0xe7   :  { %v160_v49 = vpop.f32.mrf.mxu0  ;;  %v225_v42 = vpop.f32.mrf.mxu1 }
  0xe8   :  { %959 = vxpose.xlu1.c.b16.start.end [1/1] (short) %v951_v20, 128  ;;  %v952_v43 = vpack.c.bf16 %v225_v42, %v225_v42 }
  0xe9   :  { %v2106_v51 = vpop.f32.mrf.mxu0 }
  0xea   :  { %3118 = vst [vmem:[#allocation10_spill] sm:$0xff] %v2106_v51 }
  0xeb   :  { %v164_v53 = vpop.f32.mrf.mxu0 }
  0xec   :  { %v262_v56 = vpack.c.bf16 %v164_v53, %v160_v49 }
  0xed   :  { %v2112_v54 = vpop.f32.mrf.mxu0 }
  0xee   :  { %3119 = vst [vmem:[#allocation11_spill] sm:$0xff] %v2112_v54  ;;  %877 = vmatprep.mubr.bf16.mxu1 %v262_v56 }
  0xef   :  { %v2114_v57 = vpop.f32.mrf.mxu0 }
  0xf0   :  { %3120 = vst [vmem:[#allocation12_spill] sm:$0xff] %v2114_v57 }
  0xf1   :  { %v2118_v58 = vpop.f32.mrf.mxu0 }
  0xf2   :  { %3121 = vst [vmem:[#allocation13_spill] sm:$0xff] %v2118_v58 }
  0xf3   :  { %v2123_v60 = vpop.f32.mrf.mxu0 }
  0xf4   :  { %3122 = vst [vmem:[#allocation14_spill] sm:$0xff] %v2123_v60 }
  0xf5   :  { %v2127_v62 = vpop.f32.mrf.mxu0 }
  0xf6   :  { %3123 = vst [vmem:[#allocation15_spill] sm:$0xff] %v2127_v62 }
  0xf7   :  { %v2129_v1 = vpop.f32.mrf.mxu0 }
  0xf8   :  { %3124 = vst [vmem:[#allocation16_spill] sm:$0xff] %v2129_v1 }
  0xf9   :  { %v182_v2 = vpop.f32.mrf.mxu0 }
  0xfb   :  { %v183_v3 = vpop.f32.mrf.mxu0 }
 0x101   :  { %283 = vxpose.xlu0.c.b16.start.end [1/1] (short) %v260_v30, 128 }
 0x105   :  { %975 = vxpose.xlu1.c.b16.start.end [1/1] (short) %v952_v43, 128 }
 0x146   :  { %v275_v50 = vpop.trf.xlu0 }
 0x147   :  { %1672 = vmatmul.mubr.msk.bf16.vlgmr.msra.gmra.mxu0 %vm299_vm2, %v275_v50 }
 0x148   :  { %396 = vmatprep.mubr.bf16.mxu0 %v3062_v0 }
 0x14a   :  { %v276_v55 = vpop.trf.xlu0 }
 0x14e   :  { %v277_v63 = vpop.trf.xlu0 }
 0x14f   :  { %1673 = vmatmul.mubr.msk.bf16.gmra.mxu0 %vm299_vm2, %v276_v55 }
 0x150   :  { %406 = vmatprep.mubr.bf16.mxu0 %v3062_v0 }
 0x152   :  { %v278_v4 = vpop.trf.xlu0 }
 0x156   :  { %v279_v5 = vpop.trf.xlu0 }
 0x157   :  { %1674 = vmatmul.mubr.msk.bf16.gmra.mxu0 %vm299_vm2, %v277_v63 }
 0x158   :  { %416 = vmatprep.mubr.bf16.mxu0 %v3062_v0 }
 0x15a   :  { %v280_v6 = vpop.trf.xlu0 }
 0x15e   :  { %v281_v7 = vpop.trf.xlu0 }
 0x15f   :  { %1675 = vmatmul.mubr.msk.bf16.gmra.mxu0 %vm299_vm2, %v278_v4 }
 0x160   :  { %426 = vmatprep.mubr.bf16.mxu0 %v3062_v0 }
 0x162   :  { %v282_v8 = vpop.trf.xlu0 }
 0x166   :  { %v291_v9 = vpop.trf.xlu0 }
 0x167   :  { %1676 = vmatmul.mubr.msk.bf16.gmra.mxu0 %vm299_vm2, %v279_v5 }
 0x168   :  { %436 = vmatprep.mubr.bf16.mxu0 %v3062_v0 }
 0x16a   :  { %v292_v10 = vpop.trf.xlu0 }
 0x16e   :  { %v293_v11 = vpop.trf.xlu0 }
 0x16f   :  { %1677 = vmatmul.mubr.msk.bf16.gmra.mxu0 %vm299_vm2, %v280_v6 }
 0x170   :  { %446 = vmatprep.mubr.bf16.mxu0 %v3062_v0 }
 0x172   :  { %v294_v12 = vpop.trf.xlu0 }
 0x176   :  { %v295_v13 = vpop.trf.xlu0 }
 0x177   :  { %1678 = vmatmul.mubr.msk.bf16.gmra.mxu0 %vm299_vm2, %v281_v7 }
 0x178   :  { %456 = vmatprep.mubr.bf16.mxu0 %v3062_v0 }
 0x17a   :  { %v296_v14 = vpop.trf.xlu0 }
 0x17e   :  { %v297_v15 = vpop.trf.xlu0 }
 0x17f   :  { %1679 = vmatmul.mubr.msk.bf16.gmra.mxu0 %vm299_vm2, %v282_v8 }
 0x180   :  { %466 = vmatprep.mubr.bf16.mxu0 %v3062_v0 }
 0x182   :  { %v298_v16 = vpop.trf.xlu0 }
 0x187   :  { %1680 = vmatmul.mubr.msk.bf16.gmra.mxu0 %vm299_vm2, %v291_v9 }
 0x188   :  { %476 = vmatprep.mubr.bf16.mxu0 %v3062_v0 }
 0x18f   :  { %1681 = vmatmul.mubr.msk.bf16.gmra.mxu0 %vm299_vm2, %v292_v10 }
 0x190   :  { %486 = vmatprep.mubr.bf16.mxu0 %v3062_v0 }
 0x197   :  { %1682 = vmatmul.mubr.msk.bf16.gmra.mxu0 %vm299_vm2, %v293_v11 }
 0x198   :  { %496 = vmatprep.mubr.bf16.mxu0 %v3062_v0 }
 0x19f   :  { %1683 = vmatmul.mubr.msk.bf16.gmra.mxu0 %vm299_vm2, %v294_v12 }
 0x1a0   :  { %506 = vmatprep.mubr.bf16.mxu0 %v3062_v0 }
 0x1a7   :  { %1684 = vmatmul.mubr.msk.bf16.gmra.mxu0 %vm299_vm2, %v295_v13 }
 0x1a8   :  { %516 = vmatprep.mubr.bf16.mxu0 %v3062_v0 }
 0x1af   :  { %1685 = vmatmul.mubr.msk.bf16.gmra.mxu0 %vm299_vm2, %v296_v14 }
 0x1b0   :  { %526 = vmatprep.mubr.bf16.mxu0 %v3062_v0 }
 0x1b7   :  { %1686 = vmatmul.mubr.msk.bf16.gmra.mxu0 %vm299_vm2, %v297_v15 }
 0x1b8   :  { %536 = vmatprep.mubr.bf16.mxu0 %v3062_v0 }
 0x1bf   :  { %1687 = vmatmul.mubr.msk.bf16.gmra.mxu0 %vm299_vm2, %v298_v16 }
 0x207   :  { %v2162_v21 = vpop.f32.mrf.mxu0 }
 0x208   :  { %3127 = vst [vmem:[#allocation19_spill] sm:$0xff] %v2162_v21 }
 0x209   :  { %v2164_v22 = vpop.f32.mrf.mxu0 }
 0x20b   :  { %v2166_v23 = vpop.f32.mrf.mxu0 }
 0x20c   :  { %3128 = vst [vmem:[#allocation20_spill] sm:$0xff] %v2166_v23 }
 0x20d   :  { %v2168_v24 = vpop.f32.mrf.mxu0 }
 0x20f   :  { %v2170_v25 = vpop.f32.mrf.mxu0 }
 0x210   :  { %3129 = vst [vmem:[#allocation21_spill] sm:$0xff] %v2170_v25  ;;  %v547_v57 = vmax.f32 %v2162_v21, %v2170_v25 }
 0x211   :  { %v2172_v26 = vpop.f32.mrf.mxu0 }
 0x213   :  { %v2174_v27 = vpop.f32.mrf.mxu0 }
 0x214   :  { %3130 = vst [vmem:[#allocation22_spill] sm:$0xff] %v2174_v27  ;;  %v548_v58 = vmax.f32 %v2166_v23, %v2174_v27 }
 0x215   :  { %v2176_v28 = vpop.f32.mrf.mxu0 }
 0x217   :  { %v2178_v29 = vpop.f32.mrf.mxu0 }
 0x218   :  { %3131 = vst [vmem:[#allocation23_spill] sm:$0xff] %v2178_v29  ;;  %v549_v48 = vmax.f32 %v547_v57, %v2178_v29  ;;  %v585_v29 = vmax.f32 %v2168_v24, %v2176_v28 }
 0x219   :  { %v2180_v30 = vpop.f32.mrf.mxu0 }
 0x21b   :  { %v2182_v31 = vpop.f32.mrf.mxu0 }
 0x21c   :  { %3132 = vst [vmem:[#allocation24_spill] sm:$0xff] %v2182_v31  ;;  %v550_v60 = vmax.f32 %v548_v58, %v2182_v31 }
 0x21d   :  { %v2184_v32 = vpop.f32.mrf.mxu0 }
 0x21f   :  { %v2186_v33 = vpop.f32.mrf.mxu0 }
 0x220   :  { %v551_v17 = vmax.f32 %v549_v48, %v2186_v33 }
 0x221   :  { %v2188_v34 = vpop.f32.mrf.mxu0 }
 0x223   :  { %v2190_v35 = vpop.f32.mrf.mxu0 }
 0x224   :  { %v552_v51 = vmax.f32 %v550_v60, %v2190_v35 }
 0x225   :  { %v2192_v36 = vpop.f32.mrf.mxu0 }
 0x227   :  { %v2194_v37 = vpop.f32.mrf.mxu0 }
 0x229   :  { %v2196_v38 = vpop.f32.mrf.mxu0 }
 0x22b   :  { %v2198_v39 = vpop.f32.mrf.mxu0 }
 0x22d   :  { %v2200_v40 = vpop.f32.mrf.mxu0 }
 0x22f   :  { %v2202_v41 = vpop.f32.mrf.mxu0 }
 0x231   :  { %v2204_v44 = vpop.f32.mrf.mxu0 }
 0x233   :  { %v2206_v45 = vpop.f32.mrf.mxu0 }
 0x235   :  { %v2208_v46 = vpop.f32.mrf.mxu0 }
 0x237   :  { %v2210_v47 = vpop.f32.mrf.mxu0 }
 0x239   :  { %v2212_v49 = vpop.f32.mrf.mxu0 }
 0x23b   :  { %v2214_v50 = vpop.f32.mrf.mxu0 }
 0x23d   :  { %v2216_v53 = vpop.f32.mrf.mxu0 }
 0x23f   :  { %v2218_v55 = vpop.f32.mrf.mxu0 }
 0x241   :  { %v2220_v56 = vpop.f32.mrf.mxu0 }
 0x243   :  { %v2222_v63 = vpop.f32.mrf.mxu0 }
 0x245   :  { %v2224_v2 = vpop.f32.mrf.mxu0 }
 0x247   :  { %v2226_v3 = vpop.f32.mrf.mxu0 }
 0x248   :  { %3133 = vst [vmem:[#allocation25_spill] sm:$0xff] %v2226_v3 }
 0x249   :  { %v2228_v4 = vpop.f32.mrf.mxu0 }
 0x24a   :  { %3134 = vst [vmem:[#allocation26_spill] sm:$0xff] %v2228_v4 }
 0x24b   :  { %v2230_v5 = vpop.f32.mrf.mxu0 }
 0x24c   :  { %3135 = vst [vmem:[#allocation27_spill] sm:$0xff] %v2230_v5 }
 0x24d   :  { %v2232_v6 = vpop.f32.mrf.mxu0 }
 0x24e   :  { %3136 = vst [vmem:[#allocation28_spill] sm:$0xff] %v2232_v6 }
 0x24f   :  { %v2234_v7 = vpop.f32.mrf.mxu0 }
 0x250   :  { %3137 = vst [vmem:[#allocation29_spill] sm:$0xff] %v2234_v7 }
 0x251   :  { %v2236_v8 = vpop.f32.mrf.mxu0 }
 0x253   :  { %v2238_v9 = vpop.f32.mrf.mxu0 }
 0x254   :  { %3138 = vst [vmem:[#allocation30_spill] sm:$0xff] %v2238_v9 }
 0x255   :  { %v2240_v10 = vpop.f32.mrf.mxu0 }
 0x256   :  { %3139 = vst [vmem:[#allocation31_spill] sm:$0xff] %v2240_v10 }
 0x257   :  { %v2242_v11 = vpop.f32.mrf.mxu0 }
 0x258   :  { %3140 = vst [vmem:[#allocation32_spill] sm:$0xff] %v2242_v11 }
 0x259   :  { %v2244_v12 = vpop.f32.mrf.mxu0 }
 0x25b   :  { %v2246_v13 = vpop.f32.mrf.mxu0 }
 0x25c   :  { %3141 = vst [vmem:[#allocation33_spill] sm:$0xff] %v2246_v13 }
 0x25d   :  { %v2248_v14 = vpop.f32.mrf.mxu0 }
 0x25f   :  { %v2250_v15 = vpop.f32.mrf.mxu0 }
 0x261   :  { %v2252_v16 = vpop.f32.mrf.mxu0 }
 0x263   :  { %v2254_v19 = vpop.f32.mrf.mxu0 }
 0x265   :  { %v2256_v20 = vpop.f32.mrf.mxu0 }
 0x267   :  { %v2258_v42 = vpop.f32.mrf.mxu0 }
 0x269   :  { %v2260_v43 = vpop.f32.mrf.mxu0 }
 0x26b   :  { %v2262_v0 = vpop.f32.mrf.mxu0 }
 0x26d   :  { %v2264_v59 = vpop.f32.mrf.mxu0 }
 0x26f   :  { %v2266_v61 = vpop.f32.mrf.mxu0 }
 0x271   :  { %v2268_v52 = vpop.f32.mrf.mxu0 }
 0x272   :  { %3142 = vst [vmem:[#allocation34_spill] sm:$0xff] %v2268_v52  ;;  %v554_v52 = vmax.f32 %v552_v51, %v2198_v39 }
 0x273   :  { %v2270_v62 = vpop.f32.mrf.mxu0 }
 0x274   :  { %v556_v23 = vmax.f32 %v554_v52, %v2206_v45 }
 0x275   :  { %v2272_v54 = vpop.f32.mrf.mxu0 }
 0x276   :  { %3143 = vst [vmem:[#allocation35_spill] sm:$0xff] %v2272_v54  ;;  %v553_v54 = vmax.f32 %v551_v17, %v2194_v37  ;;  %v558_v58 = vmax.f32 %v556_v23, %v2214_v50 }
 0x277   :  { %v2276_v1 = vpop.f32.mrf.mxu0 }
 0x278   :  { %v555_v21 = vmax.f32 %v553_v54, %v2202_v41  ;;  %v560_v60 = vmax.f32 %v558_v58, %v2222_v63 }
 0x279   :  { %v2283_v18 = vpop.f32.mrf.mxu0 }
 0x27a   :  { %v557_v57 = vmax.f32 %v555_v21, %v2210_v47  ;;  %v562_v51 = vmax.f32 %v560_v60, %v2230_v5 }
 0x27b   :  { %v2289_v27 = vpop.f32.mrf.mxu0 }
 0x27c   :  { %3144 = vst [vmem:[#allocation36_spill] sm:$0xff] %v2289_v27  ;;  %v559_v48 = vmax.f32 %v557_v57, %v2218_v55  ;;  %v564_v52 = vmax.f32 %v562_v51, %v2238_v9  ;;  %v584_v51 = vmax.f32 %v2164_v22, %v2172_v26 }
 0x27d   :  { %v2295_v25 = vpop.f32.mrf.mxu0 }
 0x27e   :  { %v561_v17 = vmax.f32 %v559_v48, %v2226_v3  ;;  %v566_v23 = vmax.f32 %v564_v52, %v2246_v13 }
 0x27f   :  { %v2301_v31 = vpop.f32.mrf.mxu0 }
 0x280   :  { %v563_v54 = vmax.f32 %v561_v17, %v2234_v7  ;;  %v568_v58 = vmax.f32 %v566_v23, %v2254_v19  ;;  %v587_v17 = vmax.f32 %v585_v29, %v2184_v32  ;;  %v586_v23 = vmax.f32 %v584_v51, %v2180_v30 }
 0x281   :  { %v2309_v57 = vpop.f32.mrf.mxu0 }
 0x282   :  { %v565_v21 = vmax.f32 %v563_v54, %v2242_v11  ;;  %v570_v48 = vmax.f32 %v568_v58, %v2262_v0  ;;  %v589_v5 = vmax.f32 %v587_v17, %v2192_v36  ;;  %v588_v58 = vmax.f32 %v586_v23, %v2188_v34 }
 0x283   :  { %v2320_v3 = vpop.f32.mrf.mxu0 }
 0x284   :  { %v567_v60 = vmax.f32 %v565_v21, %v2250_v15  ;;  %v572_v54 = vmax.f32 %v570_v48, %v2270_v62  ;;  %v591_v7 = vmax.f32 %v589_v5, %v2200_v40  ;;  %v590_v48 = vmax.f32 %v588_v58, %v2196_v38 }
 0x286   :  { %v569_v52 = vmax.f32 %v567_v60, %v2258_v42  ;;  %v574_v21 = vmax.f32 %v572_v54, %v2289_v27  ;;  %v593_v51 = vmax.f32 %v591_v7, %v2208_v46  ;;  %v592_v13 = vmax.f32 %v590_v48, %v2204_v44 }
 0x288   :  { %v571_v9 = vmax.f32 %v569_v52, %v2266_v61  ;;  %v576_v60 = vmax.f32 %v574_v21, %v2320_v3  ;;  %v595_v52 = vmax.f32 %v593_v51, %v2216_v53  ;;  %v594_v54 = vmax.f32 %v592_v13, %v2212_v49 }
 0x28a   :  { %v573_v29 = vmax.f32 %v571_v9, %v2276_v1  ;;  %v597_v23 = vmax.f32 %v595_v52, %v2224_v2  ;;  %v596_v5 = vmax.f32 %v594_v54, %v2220_v56 }
 0x28c   :  { %v575_v17 = vmax.f32 %v573_v29, %v2301_v31  ;;  %v599_v9 = vmax.f32 %v597_v23, %v2232_v6  ;;  %v598_v58 = vmax.f32 %v596_v5, %v2228_v4  ;;  %v3145_v23 = vld [vmem:[#allocation35_spill] sm:$0xff]  ;;  %v2347_v6 = vpop.f32.mrf.mxu0 }
 0x28e   :  { %v577_v11 = vmax.f32 %v575_v17, %v576_v60  ;;  %v601_v7 = vmax.f32 %v599_v9, %v2240_v10  ;;  %v600_v29 = vmax.f32 %v598_v58, %v2236_v8  ;;  %v3146_v9 = vld [vmem:[#allocation34_spill] sm:$0xff] }
 0x290   :  { %v578_v21 = vrot.slane %v577_v11, 4  ;;  %v603_v48 = vmax.f32 %v601_v7, %v2248_v14  ;;  %v602_v60 = vmax.f32 %v600_v29, %v2244_v12 }
 0x292   :  { %v579_v27 = vmax.f32 %v577_v11, %v578_v21  ;;  %v605_v13 = vmax.f32 %v603_v48, %v2256_v20  ;;  %v604_v51 = vmax.f32 %v602_v60, %v2252_v16 }
 0x294   :  { %v607_v17 = vmax.f32 %v605_v13, %v2264_v59  ;;  %v580_v52 = vrot.slane %v579_v27, 2  ;;  %v606_v54 = vmax.f32 %v604_v51, %v2260_v43 }
 0x296   :  { %v609_v5 = vmax.f32 %v607_v17, %v3145_v23  ;;  %v608_v58 = vmax.f32 %v606_v54, %v3146_v9  ;;  %v581_v11 = vmax.f32 %v579_v27, %v580_v52 }
 0x298   :  { %v611_v7 = vmax.f32 %v609_v5, %v2295_v25  ;;  %v610_v21 = vmax.f32 %v608_v58, %v2283_v18  ;;  %v582_v60 = vrot.slane %v581_v11, 1 }
 0x29a   :  { %v613_v29 = vmax.f32 %v611_v7, %v2347_v6  ;;  %v612_v48 = vmax.f32 %v610_v21, %v2309_v57  ;;  %v2354_v4 = vmax.f32 %v581_v11, %v582_v60 }
 0x29c   :  { %v614_v13 = vmax.f32 %v612_v48, %v613_v29  ;;  %v665_v17 = vsub.f32 %v2250_v15, %v2354_v4  ;;  %v667_v54 = vsub.f32 %v2254_v19, %v2354_v4  ;;  %v669_v27 = vsub.f32 %v2258_v42, %v2354_v4 }
 0x29d   :  { %v671_v52 = vsub.f32 %v2262_v0, %v2354_v4  ;;  %v673_v5 = vsub.f32 %v2266_v61, %v2354_v4  ;;  %v675_v7 = vsub.f32 %v2270_v62, %v2354_v4  ;;  %v637_v61 = vsub.f32 %v2194_v37, %v2354_v4 }
 0x29e   :  { %v615_v51 = vrot.slane %v614_v13, 4  ;;  %v773_v58 = vmul.f32 1.442695, %v665_v17  ;;  %v777_v21 = vmul.f32 1.442695, %v667_v54  ;;  %v639_v62 = vsub.f32 %v2198_v39, %v2354_v4 }
 0x29f   :  { %v781_v15 = vmul.f32 1.442695, %v669_v27  ;;  %v785_v29 = vmul.f32 1.442695, %v671_v52  ;;  %v789_v48 = vmul.f32 1.442695, %v673_v5  ;;  %v641_v42 = vsub.f32 %v2202_v41, %v2354_v4 }
 0x2a0   :  { %v616_v10 = vmax.f32 %v614_v13, %v615_v51  ;;  %1716 = vpow2.f32 %v773_v58  ;;  %v793_v60 = vmul.f32 1.442695, %v675_v7  ;;  %v649_v51 = vsub.f32 %v2218_v55, %v2354_v4 }
 0x2a1   :  { %1718 = vpow2.f32 %v777_v21  ;;  %v717_v17 = vmul.f32 1.442695, %v637_v61  ;;  %v651_v54 = vsub.f32 %v2222_v63, %v2354_v4  ;;  %v721_v27 = vmul.f32 1.442695, %v639_v62 }
 0x2a2   :  { %v617_v11 = vrot.slane %v616_v10, 2  ;;  %1720 = vpow2.f32 %v781_v15  ;;  %v725_v52 = vmul.f32 1.442695, %v641_v42  ;;  %v741_v7 = vmul.f32 1.442695, %v649_v51 }
 0x2a3   :  { %1722 = vpow2.f32 %v785_v29  ;;  %v745_v21 = vmul.f32 1.442695, %v651_v54 }
 0x2a4   :  { %v618_v19 = vmax.f32 %v616_v10, %v617_v11  ;;  %1724 = vpow2.f32 %v789_v48  ;;  %v643_v10 = vsub.f32 %v2206_v45, %v2354_v4 }
 0x2a5   :  { %1726 = vpow2.f32 %v793_v60 }
 0x2a6   :  { %v619_v0 = vrot.slane %v618_v19, 1  ;;  %v729_v45 = vmul.f32 1.442695, %v643_v10  ;;  %1728 = vpow2.f32 %v717_v17 }
 0x2a7   :  { %1730 = vpow2.f32 %v721_v27 }
 0x2a8   :  { %v2374_v13 = vmax.f32 %v618_v19, %v619_v0  ;;  %1732 = vpow2.f32 %v725_v52  ;;  %v647_v19 = vsub.f32 %v2214_v50, %v2354_v4 }
 0x2a9   :  { %1734 = vpow2.f32 %v729_v45 }
 0x2aa   :  { %v646_v39 = vsub.f32 %v2212_v49, %v2374_v13  ;;  %v648_v5 = vsub.f32 %v2216_v53, %v2374_v13  ;;  %v650_v55 = vsub.f32 %v2220_v56, %v2374_v13  ;;  %v652_v49 = vsub.f32 %v2224_v2, %v2374_v13 }
 0x2ab   :  { %v645_v53 = vsub.f32 %v2210_v47, %v2354_v4  ;;  %v642_v2 = vsub.f32 %v2204_v44, %v2374_v13  ;;  %1736 = vpow2.f32 %v741_v7  ;;  %v644_v61 = vsub.f32 %v2208_v46, %v2374_v13 }
 0x2ac   :  { %v735_v29 = vmul.f32 1.442695, %v646_v39  ;;  %v739_v60 = vmul.f32 1.442695, %v648_v5  ;;  %v743_v0 = vmul.f32 1.442695, %v650_v55  ;;  %1738 = vpow2.f32 %v745_v21 }
 0x2ad   :  { %v2382_v37 = vpop.eup %1716  ;;  %v747_v62 = vmul.f32 1.442695, %v652_v49  ;;  %v634_v42 = vsub.f32 %v2188_v34, %v2374_v13  ;;  %v733_v10 = vmul.f32 1.442695, %v645_v53  ;;  %v636_v50 = vsub.f32 %v2192_v36, %v2374_v13 }
 0x2ae   :  { %v2386_v41 = vpop.eup %1718  ;;  %1740 = vpow2.f32 %v735_v29  ;;  %v737_v51 = vmul.f32 1.442695, %v647_v19  ;;  %v638_v44 = vsub.f32 %v2196_v38, %v2374_v13  ;;  %v727_v17 = vmul.f32 1.442695, %v642_v2  ;;  %v3147_v2 = vld [vmem:[#allocation23_spill] sm:$0xff] }
 0x2af   :  { %v2390_v58 = vpop.eup %1720  ;;  %v835_v63 = vpack.c.bf16 %v2386_v41, %v2382_v37  ;;  %1742 = vpow2.f32 %v739_v60  ;;  %v640_v46 = vsub.f32 %v2200_v40, %v2374_v13  ;;  %v731_v54 = vmul.f32 1.442695, %v644_v61  ;;  %v3164_v41 = vld [vmem:[#allocation18_spill] sm:$0xff] }
 0x2b0   :  { %v2396_v11 = vpop.eup %1722  ;;  %1744 = vpow2.f32 %v743_v0  ;;  %v670_v34 = vsub.f32 %v2260_v43, %v2374_v13  ;;  %v711_v27 = vmul.f32 1.442695, %v634_v42  ;;  %v672_v36 = vsub.f32 %v2264_v59, %v2374_v13 }
 0x2b1   :  { %v2400_v15 = vpop.eup %1724  ;;  %v837_v56 = vpack.c.bf16 %v2396_v11, %v2390_v58  ;;  %1746 = vpow2.f32 %v747_v62  ;;  %v715_v39 = vmul.f32 1.442695, %v636_v50  ;;  %v674_v38 = vsub.f32 %v3146_v9, %v2374_v13  ;;  %v3148_v62 = vld [vmem:[#allocation24_spill] sm:$0xff] }
 0x2b2   :  { %v2406_v48 = vpop.eup %1726  ;;  %1748 = vpow2.f32 %v733_v10  ;;  %v719_v52 = vmul.f32 1.442695, %v638_v44  ;;  %v676_v40 = vsub.f32 %v3145_v23, %v2374_v13  ;;  %v723_v45 = vmul.f32 1.442695, %v640_v46 }
 0x2b3   :  { %v839_v47 = vpack.c.bf16 %v2406_v48, %v2400_v15  ;;  %1750 = vpow2.f32 %v737_v51  ;;  %v2430_v5 = vpop.eup %1728  ;;  %v633_v55 = vsub.f32 %v2186_v33, %v2354_v4  ;;  %v783_v59 = vmul.f32 1.442695, %v670_v34 }
 0x2b4   :  { %1752 = vpow2.f32 %v727_v17  ;;  %v2434_v43 = vpop.eup %1730  ;;  %v635_v9 = vsub.f32 %v2190_v35, %v2354_v4  ;;  %v787_v49 = vmul.f32 1.442695, %v672_v36  ;;  %v630_v23 = vsub.f32 %v2180_v30, %v2374_v13 }
 0x2b5   :  { %1754 = vpow2.f32 %v731_v54  ;;  %v2438_v7 = vpop.eup %1732  ;;  %v791_v53 = vmul.f32 1.442695, %v674_v38  ;;  %v632_v33 = vsub.f32 %v2184_v32, %v2374_v13  ;;  %v795_v19 = vmul.f32 1.442695, %v676_v40  ;;  %v3149_v54 = vld [vmem:[#allocation21_spill] sm:$0xff] }
 0x2b6   :  { %1756 = vpow2.f32 %v711_v27  ;;  %v2442_v21 = vpop.eup %1734  ;;  %v629_v0 = vsub.f32 %v3147_v2, %v2354_v4  ;;  %v709_v35 = vmul.f32 1.442695, %v633_v55  ;;  %v631_v42 = vsub.f32 %v3148_v62, %v2354_v4 }
 0x2b7   :  { %1758 = vpow2.f32 %v715_v39  ;;  %v713_v10 = vmul.f32 1.442695, %v635_v9  ;;  %v626_v50 = vsub.f32 %v2172_v26, %v2374_v13  ;;  %v703_v51 = vmul.f32 1.442695, %v630_v23  ;;  %v3150_v39 = vld [vmem:[#allocation22_spill] sm:$0xff] }
 0x2b8   :  { %1760 = vpow2.f32 %v719_v52  ;;  %v1737_v29 = vpop.eup %1736  ;;  %v628_v44 = vsub.f32 %v2176_v28, %v2374_v13  ;;  %v707_v17 = vmul.f32 1.442695, %v632_v33  ;;  %v625_v34 = vsub.f32 %v3149_v54, %v2354_v4 }
 0x2b9   :  { %1762 = vpow2.f32 %v723_v45  ;;  %v1739_v60 = vpop.eup %1738  ;;  %v701_v27 = vmul.f32 1.442695, %v629_v0  ;;  %v627_v38 = vsub.f32 %v3150_v39, %v2354_v4  ;;  %v705_v52 = vmul.f32 1.442695, %v631_v42 }
 0x2ba   :  { %1764 = vpow2.f32 %v783_v59  ;;  %v622_v45 = vsub.f32 %v2164_v22, %v2374_v13  ;;  %v695_v28 = vmul.f32 1.442695, %v626_v50  ;;  %v827_v55 = vpack.c.bf16 %v1739_v60, %v1737_v29  ;;  %v3151_v22 = vld [vmem:[#allocation19_spill] sm:$0xff]  ;;  %v3152_v29 = vld [vmem:[#allocation20_spill] sm:$0xff] }
 0x2bb   :  { %v1741_v61 = vpop.eup %1740  ;;  %1766 = vpow2.f32 %v787_v49  ;;  %v624_v9 = vsub.f32 %v2168_v24, %v2374_v13  ;;  %v699_v49 = vmul.f32 1.442695, %v628_v44  ;;  %v684_v33 = vsub.f32 %v2347_v6, %v2374_v13 }
 0x2bc   :  { %v1743_v30 = vpop.eup %1742  ;;  %1768 = vpow2.f32 %v791_v53  ;;  %v621_v0 = vsub.f32 %v3151_v22, %v2354_v4  ;;  %v623_v60 = vsub.f32 %v3152_v29, %v2354_v4  ;;  %v687_v62 = vmul.f32 1.442695, %v622_v45  ;;  %v3153_v45 = vld [vmem:[#allocation36_spill] sm:$0xff] }
 0x2bd   :  { %v1745_v32 = vpop.eup %1744  ;;  %1770 = vpow2.f32 %v795_v19  ;;  %v826_v23 = vpack.c.bf16 %v1743_v30, %v1741_v61  ;;  %v693_v19 = vmul.f32 1.442695, %v625_v34  ;;  %v682_v6 = vsub.f32 %v2309_v57, %v2374_v13 }
 0x2be   :  { %v1747_v46 = vpop.eup %1746  ;;  %1772 = vpow2.f32 %v709_v35  ;;  %v697_v35 = vmul.f32 1.442695, %v627_v38  ;;  %v689_v54 = vmul.f32 1.442695, %v623_v60  ;;  %v678_v34 = vsub.f32 %v2283_v18, %v2374_v13 }
 0x2bf   :  { %v1749_v36 = vpop.eup %1748  ;;  %1774 = vpow2.f32 %v713_v10  ;;  %v828_v26 = vpack.c.bf16 %v1747_v46, %v1745_v32  ;;  %v691_v10 = vmul.f32 1.442695, %v624_v9  ;;  %v811_v32 = vmul.f32 1.442695, %v684_v33 }
 0x2c0   :  { %v1751_v40 = vpop.eup %1750  ;;  %1776 = vpow2.f32 %v703_v51  ;;  %v683_v51 = vsub.f32 %v2320_v3, %v2354_v4  ;;  %v685_v46 = vmul.f32 1.442695, %v621_v0  ;;  %v680_v3 = vsub.f32 %v2295_v25, %v2374_v13 }
 0x2c1   :  { %v1753_v59 = vpop.eup %1752  ;;  %1778 = vpow2.f32 %v707_v17  ;;  %845 = vmatprep.subr.bf16.mxu1 %v828_v26  ;;  %v825_v61 = vpack.c.bf16 %v1751_v40, %v1749_v36  ;;  %v681_v17 = vsub.f32 %v2301_v31, %v2354_v4  ;;  %v807_v39 = vmul.f32 1.442695, %v682_v6 }
 0x2c2   :  { %v1755_v53 = vpop.eup %1754  ;;  %1780 = vpow2.f32 %v701_v27  ;;  %846 = vmatpush1.bf16.msra.mxu1 %v827_v55  ;;  %v823_v27 = vpack.c.bf16 %v2442_v21, %v2438_v7  ;;  %v809_v26 = vmul.f32 1.442695, %v683_v51  ;;  %v677_v25 = vsub.f32 %v2276_v1, %v2354_v4 }
 0x2c3   :  { %v1757_v2 = vpop.eup %1756  ;;  %1782 = vpow2.f32 %v705_v52  ;;  %847 = vmatprep.subr.bf16.mxu1 %v826_v23  ;;  %v824_v30 = vpack.c.bf16 %v1755_v53, %v1753_v59  ;;  %v805_v40 = vmul.f32 1.442695, %v681_v17  ;;  %v799_v55 = vmul.f32 1.442695, %v678_v34 }
 0x2c4   :  { %v1759_v24 = vpop.eup %1758  ;;  %1784 = vpow2.f32 %v695_v28  ;;  %v679_v28 = vsub.f32 %v3153_v45, %v2354_v4  ;;  %v821_v59 = vpack.c.bf16 %v2434_v43, %v2430_v5  ;;  %v797_v33 = vmul.f32 1.442695, %v677_v25 }
 0x2c5   :  { %v1761_v42 = vpop.eup %1760  ;;  %1786 = vpow2.f32 %v699_v49  ;;  %v803_v49 = vmul.f32 1.442695, %v680_v3  ;;  %v820_v23 = vpack.c.bf16 %v1759_v24, %v1757_v2  ;;  %v666_v2 = vsub.f32 %v2252_v16, %v2374_v13 }
 0x2c6   :  { %v1763_v50 = vpop.eup %1762  ;;  %1788 = vpow2.f32 %v693_v19  ;;  %848 = vmatpush1.bf16.msra.mxu1 %v825_v61  ;;  %v801_v22 = vmul.f32 1.442695, %v679_v28  ;;  %v668_v61 = vsub.f32 %v2256_v20, %v2374_v13  ;;  %v664_v16 = vsub.f32 %v2248_v14, %v2374_v13  ;;  %v3154_v20 = vld [vmem:[#allocation32_spill] sm:$0xff] }
 0x2c7   :  { %v2474_v44 = vpop.eup %1764  ;;  %1790 = vpow2.f32 %v697_v35  ;;  %849 = vmatprep.subr.bf16.mxu1 %v824_v30  ;;  %v822_v31 = vpack.c.bf16 %v1763_v50, %v1761_v42  ;;  %v662_v50 = vsub.f32 %v2244_v12, %v2374_v13  ;;  %v775_v51 = vmul.f32 1.442695, %v666_v2 }
 0x2c8   :  { %v2478_v57 = vpop.eup %1766  ;;  %1792 = vpow2.f32 %v687_v62  ;;  %v661_v3 = vsub.f32 %v3154_v20, %v2354_v4  ;;  %v658_v12 = vsub.f32 %v2236_v8, %v2374_v13  ;;  %v771_v45 = vmul.f32 1.442695, %v664_v16 }
 0x2c9   :  { %v2486_v36 = vpop.eup %1768  ;;  %1794 = vpow2.f32 %v691_v10  ;;  %v838_v38 = vpack.c.bf16 %v2478_v57, %v2474_v44 }
 0x2ca   :  { %v2490_v52 = vpop.eup %1770  ;;  %1796 = vpow2.f32 %v811_v32  ;;  %850 = vmatpush1.bf16.msra.mxu1 %v823_v27 }
 0x2cb   :  { %v1773_v18 = vpop.eup %1772  ;;  %1798 = vpow2.f32 %v685_v46  ;;  %851 = vmatprep.subr.bf16.mxu1 %v822_v31  ;;  %v840_v7 = vpack.c.bf16 %v2490_v52, %v2486_v36  ;;  %v779_v46 = vmul.f32 1.442695, %v668_v61 }
 0x2cc   :  { %v1775_v21 = vpop.eup %1774  ;;  %1800 = vpow2.f32 %v689_v54 }
 0x2cd   :  { %v1777_v9 = vpop.eup %1776  ;;  %1802 = vpow2.f32 %v807_v39  ;;  %v819_v0 = vpack.c.bf16 %v1775_v21, %v1773_v18  ;;  %v3155_v39 = vld [vmem:[#allocation33_spill] sm:$0xff]  ;;  %v767_v18 = vmul.f32 1.442695, %v662_v50 }
 0x2ce   :  { %v1779_v1 = vpop.eup %1778  ;;  %1804 = vpow2.f32 %v809_v26  ;;  %852 = vmatpush1.bf16.msra.mxu1 %v821_v59  ;;  %v663_v31 = vsub.f32 %v3155_v39, %v2354_v4  ;;  %v3157_v59 = vld [vmem:[#allocation29_spill] sm:$0xff] }
 0x2cf   :  { %v1781_v53 = vpop.eup %1780  ;;  %1806 = vpow2.f32 %v805_v40  ;;  %853 = vmatprep.subr.bf16.mxu1 %v820_v23  ;;  %v818_v60 = vpack.c.bf16 %v1779_v1, %v1777_v9  ;;  %v3156_v40 = vld [vmem:[#allocation31_spill] sm:$0xff]  ;;  %v657_v9 = vsub.f32 %v3157_v59, %v2354_v4  ;;  %v3158_v23 = vld [vmem:[#allocation30_spill] sm:$0xff] }
 0x2d0   :  { %v1783_v19 = vpop.eup %1782  ;;  %1808 = vpow2.f32 %v799_v55  ;;  %v660_v21 = vsub.f32 %v3156_v40, %v2374_v13  ;;  %v659_v1 = vsub.f32 %v3158_v23, %v2354_v4  ;;  %v769_v8 = vmul.f32 1.442695, %v663_v31  ;;  %v3165_v31 = vld [vmem:[#allocation10_spill] sm:$0xff]  ;;  %v3171_v40 = vld [vmem:[#allocation16_spill] sm:$0xff]  ;;  %v3175_v59 = vld [vmem:[#allocation15_spill] sm:$0xff] }
 0x2d1   :  { %v1785_v29 = vpop.eup %1784  ;;  %1810 = vpow2.f32 %v803_v49  ;;  %v817_v24 = vpack.c.bf16 %v1783_v19, %v1781_v53  ;;  %v765_v49 = vmul.f32 1.442695, %v661_v3  ;;  %v757_v2 = vmul.f32 1.442695, %v657_v9 }
 0x2d2   :  { %v1787_v35 = vpop.eup %1786  ;;  %854 = vmatpush1.bf16.msra.mxu1 %v819_v0  ;;  %1812 = vpow2.f32 %v797_v33  ;;  %v3159_v33 = vld [vmem:[#allocation26_spill] sm:$0xff]  ;;  %v761_v61 = vmul.f32 1.442695, %v659_v1  ;;  %v265_v9 = vpack.c.bf16 %v3175_v59, %v3175_v59  ;;  %v3177_v23 = vmov 0  }
 0x2d3   :  { %v1789_v5 = vpop.eup %1788  ;;  %855 = vmatprep.subr.bf16.mxu1 %v818_v60  ;;  %1814 = vpow2.f32 %v801_v22  ;;  %v816_v42 = vpack.c.bf16 %v1787_v35, %v1785_v29  ;;  %v654_v19 = vsub.f32 %v3159_v33, %v2374_v13  ;;  %v759_v22 = vmul.f32 1.442695, %v658_v12  ;;  %v3160_v60 = vld [vmem:[#allocation28_spill] sm:$0xff] }
 0x2d4   :  { %v1791_v43 = vpop.eup %1790  ;;  %1816 = vpow2.f32 %v775_v51  ;;  %v656_v35 = vsub.f32 %v3160_v60, %v2374_v13 }
 0x2d5   :  { %v1793_v62 = vpop.eup %1792  ;;  %v815_v32 = vpack.c.bf16 %v1791_v43, %v1789_v5  ;;  %1818 = vpow2.f32 %v779_v46  ;;  %v763_v5 = vmul.f32 1.442695, %v660_v21  ;;  %v266_v21 = vpack.c.bf16 %v3171_v40, %v3171_v40 }
 0x2d6   :  { %v1795_v6 = vpop.eup %1794  ;;  %856 = vmatpush1.bf16.msra.mxu1 %v817_v24  ;;  %1820 = vpow2.f32 %v767_v18  ;;  %v3161_v24 = vld [vmem:[#allocation25_spill] sm:$0xff]  ;;  %v755_v50 = vmul.f32 1.442695, %v656_v35  ;;  %v3168_v18 = vld [vmem:[#allocation14_spill] sm:$0xff] }
 0x2d7   :  { %v1797_v10 = vpop.eup %1796  ;;  %857 = vmatprep.subr.bf16.mxu1 %v816_v42  ;;  %v814_v54 = vpack.c.bf16 %v1795_v6, %v1793_v62  ;;  %1822 = vpow2.f32 %v771_v45  ;;  %v653_v62 = vsub.f32 %v3161_v24, %v2354_v4  ;;  %v3162_v42 = vld [vmem:[#allocation27_spill] sm:$0xff]  ;;  %v3172_v45 = vld [vmem:[#allocation13_spill] sm:$0xff] }
 0x2d8   :  { %v1799_v30 = vpop.eup %1798  ;;  %1824 = vpow2.f32 %v765_v49  ;;  %v655_v6 = vsub.f32 %v3162_v42, %v2354_v4  ;;  %v2562_v49 = vpop.f32.mrf.mxu1 }
 0x2d9   :  { %v1801_v17 = vpop.eup %1800  ;;  %1826 = vpow2.f32 %v769_v8  ;;  %v749_v13 = vmul.f32 1.442695, %v653_v62  ;;  %3176 = vst [vmem:[#allocation35_spill] sm:$0xff] %v2562_v49 }
 0x2da   :  { %v1803_v34 = vpop.eup %1802  ;;  %858 = vmatpush1.bf16.msra.mxu1 %v815_v32  ;;  %v813_v25 = vpack.c.bf16 %v1801_v17, %v1799_v30  ;;  %1828 = vpow2.f32 %v759_v22  ;;  %v753_v51 = vmul.f32 1.442695, %v655_v6  ;;  %v231_v1 = vpop.f32.mrf.mxu1 }
 0x2db   :  { %v1805_v27 = vpop.eup %1804  ;;  %859 = vmatprep.subr.bf16.mxu1 %v814_v54  ;;  %v844_v28 = vpack.c.bf16 %v1797_v10, %v1803_v34  ;;  %v751_v10 = vmul.f32 1.442695, %v654_v19  ;;  %1830 = vpow2.f32 %v763_v5 }
 0x2dc   :  { %v1807_v26 = vpop.eup %1806  ;;  %1832 = vpow2.f32 %v757_v2  ;;  %v2565_v8 = vpop.f32.mrf.mxu1 }
 0x2dd   :  { %v1809_v14 = vpop.eup %1808  ;;  %v843_v0 = vpack.c.bf16 %v1805_v27, %v1807_v26  ;;  %1834 = vpow2.f32 %v761_v61  ;;  %v3163_v27 = vld [vmem:[#allocation17_spill] sm:$0xff]  ;;  %3178 = vst [vmem:[#allocation34_spill] sm:$0xff] %v2565_v8 }
 0x2de   :  { %v1811_v55 = vpop.eup %1810  ;;  %860 = vmatpush1.bf16.msra.mxu1 %v813_v25  ;;  %1836 = vpow2.f32 %v751_v10  ;;  %v949_v37 = vpack.c.bf16 %v3163_v27, %v3163_v27  ;;  %v3166_v26 = vld [vmem:[#allocation9_spill] sm:$0xff]  ;;  %v3169_v25 = vld [vmem:[#allocation12_spill] sm:$0xff]  ;;  %v235_v19 = vpop.f32.mrf.mxu1 }
 0x2df   :  { %861 = vmatprep.subr.bf16.mxu1 %v844_v28  ;;  %v1813_v53 = vpop.eup %1812  ;;  %v842_v43 = vpack.c.bf16 %v1811_v55, %v1809_v14  ;;  %1838 = vpow2.f32 %v755_v50  ;;  %v3167_v12 = vpack.c.bf16 %v3165_v31, %v3166_v26  ;;  %v3170_v14 = vpack.c.bf16 %v3168_v18, %v3169_v25  ;;  %v3173_v28 = vld [vmem:[#allocation11_spill] sm:$0xff] }
 0x2e0   :  { %v1815_v29 = vpop.eup %1814  ;;  %1840 = vpow2.f32 %v749_v13  ;;  %v1040_v39 = vsel %vm101_vm0, %v949_v37, 0  ;;  %v3174_v55 = vpack.c.bf16 %v3172_v45, %v3173_v28  ;;  %v954_v22 = vpack.c.bf16 %v235_v19, %v231_v1 }
 0x2e1   :  { %v841_v30 = vpack.c.bf16 %v1815_v29, %v1813_v53  ;;  %v1817_v32 = vpop.eup %1816  ;;  %1842 = vpow2.f32 %v753_v51  ;;  %v967_v53 = vpop.trf.xlu1  ;;  %v2630_v25 = vstv %s3060_s2  ;;  %s2044_s2 = smov [#allocation6]  }
 0x2e2   :  { %862 = vmatpush2.bf16.msra.mxu1 %v843_v0  ;;  %v1819_v17 = vpop.eup %1818  ;;  %v2570_v0 = vpop.f32.mrf.mxu1  ;;  %1568 = vmatprep.mubr.bf16.mxu0 %v954_v22  ;;  %3188 = vst [vmem:[#allocation31_spill] sm:$0xff] %v2630_v25  ;;  %s1645_s27 = sshll.u32 %s2044_s2, 4  ;;  %s1646_s27 = int_to_ptr.vmem [resolvable:$true] %s1645_s27 }
 0x2e3   :  { %863 = vmatprep.subr.bf16.mxu1 %v842_v43  ;;  %v1821_v4 = vpop.eup %1820  ;;  %v836_v16 = vpack.c.bf16 %v1819_v17, %v1817_v32  ;;  %3179 = vst [vmem:[#allocation23_spill] sm:$0xff] %v2570_v0  ;;  %s2016_s28 = scalar_lea.vmem %s1646_s27, 2048  ;;  %p2021_p6 = scmp.lt.s32.totalorder %s1646_s27, %s1646_s27 }
 0x2e4   :  { %v1823_v46 = vpop.eup %1822  ;;  %v2573_v29 = vpop.f32.mrf.mxu1  ;;  %p2017_p5 = scmp.ne.s32.totalorder %s1646_s27, %s2016_s28  ;;  %p2022_p7 = scmp.lt.s32.totalorder %s2016_s28, %s2016_s28 }
 0x2e5   :  { %v1825_v36 = vpop.eup %1824  ;;  %v834_v54 = vpack.c.bf16 %v1823_v46, %v1821_v4  ;;  %3180 = vst [vmem:[#allocation24_spill] sm:$0xff] %v2573_v29  ;;  %v968_v35 = vpop.trf.xlu1 }
 0x2e6   :  { %864 = vmatpush2.bf16.msra.mxu1 %v841_v30  ;;  %v1827_v52 = vpop.eup %1826  ;;  %v2575_v60 = vpop.f32.mrf.mxu1  ;;  %p2023_p8 = por %p2022_p7, %p2021_p6 }
 0x2e7   :  { %865 = vmatprep.subr.bf16.mxu1 %v840_v7  ;;  %v1829_v7 = vpop.eup %1828  ;;  %v833_v44 = vpack.c.bf16 %v1827_v52, %v1825_v36  ;;  %3181 = vst [vmem:[#allocation21_spill] sm:$0xff] %v2575_v60 }
 0x2e8   :  { %v1831_v15 = vpop.eup %1830  ;;  %v2579_v43 = vpop.f32.mrf.mxu1  ;;  %p2024_p9 = pnand %p2023_p8, %p2017_p5 }
 0x2e9   :  { %v1833_v48 = vpop.eup %1832  ;;  %3182 = vst [vmem:[#allocation22_spill] sm:$0xff] %v2579_v43  ;;  %v969_v42 = vpop.trf.xlu1 }
 0x2ea   :  { %866 = vmatpush2.bf16.msra.mxu1 %v839_v47  ;;  %v1835_v47 = vpop.eup %1834  ;;  %v2584_v24 = vpop.f32.mrf.mxu1 }
 0x2eb   :  { %867 = vmatprep.subr.bf16.mxu1 %v838_v38  ;;  %v1837_v57 = vpop.eup %1836  ;;  %v832_v38 = vpack.c.bf16 %v1831_v15, %v1829_v7  ;;  %v831_v11 = vpack.c.bf16 %v1835_v47, %v1833_v48  ;;  %3183 = vst [vmem:[#allocation19_spill] sm:$0xff] %v2584_v24 }
 0x2ec   :  { %v1839_v34 = vpop.eup %1838  ;;  %v2587_v62 = vpop.f32.mrf.mxu1 }
 0x2ed   :  { %v1841_v58 = vpop.eup %1840  ;;  %v830_v20 = vpack.c.bf16 %v1839_v34, %v1837_v57  ;;  %3184 = vst [vmem:[#allocation20_spill] sm:$0xff] %v2587_v62  ;;  %v970_v10 = vpop.trf.xlu1 }
 0x2ee   :  { %868 = vmatpush2.bf16.msra.mxu1 %v837_v56  ;;  %v1843_v56 = vpop.eup %1842  ;;  %v253_v61 = vpop.f32.mrf.mxu1 }
 0x2ef   :  { %869 = vmatprep.subr.bf16.mxu1 %v836_v16  ;;  %v829_v3 = vpack.c.bf16 %v1843_v56, %v1841_v58  ;;  %v908_v56 = vlaneseq }
 0x2f0   :  { %v254_v6 = vpop.f32.mrf.mxu1 }
 0x2f1   :  { %v971_v30 = vpop.trf.xlu1  ;;  %v909_v27 = vshrl.u32 %v908_v56, 7  ;;  %v1980_v6 = vld [vmem:[#allocation3] sm:$0xff] }
 0x2f2   :  { %870 = vmatpush2.bf16.msra.mxu1 %v835_v63  ;;  %v950_v63 = vpack.c.bf16 %v3164_v41, %v3164_v41 }
 0x2f3   :  { %871 = vmatprep.subr.bf16.mxu1 %v834_v54 }
 0x2f5   :  { %v972_v50 = vpop.trf.xlu1 }
 0x2f6   :  { %872 = vmatpush2.bf16.msra.mxu1 %v833_v44 }
 0x2f7   :  { %873 = vmatprep.subr.bf16.mxu1 %v832_v38 }
 0x2f9   :  { %v973_v13 = vpop.trf.xlu1 }
 0x2fa   :  { %874 = vmatpush2.bf16.msra.mxu1 %v831_v11 }
 0x2fb   :  { %875 = vmatprep.subr.bf16.mxu1 %v830_v20 }
 0x2fd   :  { %v974_v51 = vpop.trf.xlu1 }
 0x2fe   :  { %876 = vmatpush2.bf16.msra.mxu1 %v829_v3 }
 0x2ff   :  { %1688 = vmatprep.subr.msk.bf16.mxu1 %vm101_vm0, %v950_v63  ;;  %v2620_v63 = vsub.s32 0, %v909_v27 }
 0x301   :  { %878 = vmatmul.mubr.bf16.vlgmr.msra.gmra.mxu1 %v3167_v12  ;;  %v983_v32 = vpop.trf.xlu1  ;;  %3186 = vst [vmem:[#allocation32_spill] sm:$0xff] %v2620_v63 }
 0x302   :  { %887 = vmatprep.mubr.bf16.mxu1 %v3170_v14  ;;  %1060 = vmatpush1.bf16.msra.mxu1 %v1040_v39 }
 0x305   :  { %v984_v17 = vpop.trf.xlu1 }
 0x309   :  { %888 = vmatmul.mubr.bf16.gmra.mxu1 %v3174_v55  ;;  %v985_v4 = vpop.trf.xlu1 }
 0x30a   :  { %897 = vmatprep.mubr.bf16.mxu1 %v266_v21 }
 0x30d   :  { %v986_v16 = vpop.trf.xlu1 }
 0x311   :  { %898 = vmatmul.mubr.bf16.gmra.mxu1 %v265_v9  ;;  %v987_v46 = vpop.trf.xlu1 }
 0x312   :  { %1077 = vmatprep.mubr.bf16.mxu1 %v3177_v23 }
 0x315   :  { %v988_v36 = vpop.trf.xlu1 }
 0x319   :  { %1689 = vmatmul.mubr.msk.bf16.vlgmr.msra.gmra.mxu1 %vm299_vm2, %v967_v53  ;;  %v989_v52 = vpop.trf.xlu1 }
 0x31a   :  { %1087 = vmatprep.mubr.bf16.mxu1 %v3177_v23 }
 0x31d   :  { %v990_v7 = vpop.trf.xlu1 }
 0x321   :  { %1690 = vmatmul.mubr.msk.bf16.gmra.mxu1 %vm299_vm2, %v968_v35 }
 0x322   :  { %1097 = vmatprep.mubr.bf16.mxu1 %v3177_v23 }
 0x329   :  { %1691 = vmatmul.mubr.msk.bf16.gmra.mxu1 %vm299_vm2, %v969_v42 }
 0x32a   :  { %1107 = vmatprep.mubr.bf16.mxu1 %v3177_v23 }
 0x331   :  { %1692 = vmatmul.mubr.msk.bf16.gmra.mxu1 %vm299_vm2, %v970_v10 }
 0x332   :  { %1117 = vmatprep.mubr.bf16.mxu1 %v3177_v23 }
 0x339   :  { %1693 = vmatmul.mubr.msk.bf16.gmra.mxu1 %vm299_vm2, %v971_v30  ;;  %v1981_v30 = vld [vmem:[#allocation3 + $0x20] sm:$0xff] }
 0x33a   :  { %1127 = vmatprep.mubr.bf16.mxu1 %v3177_v23 }
 0x341   :  { %1694 = vmatmul.mubr.msk.bf16.gmra.mxu1 %vm299_vm2, %v972_v50 }
 0x342   :  { %1137 = vmatprep.mubr.bf16.mxu1 %v3177_v23 }
 0x349   :  { %1695 = vmatmul.mubr.msk.bf16.gmra.mxu1 %vm299_vm2, %v973_v13  ;;  %v1982_v13 = vld [vmem:[#allocation3 + $0x40] sm:$0xff] }
 0x34a   :  { %1147 = vmatprep.mubr.bf16.mxu1 %v3177_v23 }
 0x351   :  { %1696 = vmatmul.mubr.msk.bf16.gmra.mxu1 %vm299_vm2, %v974_v51 }
 0x352   :  { %1157 = vmatprep.mubr.bf16.mxu1 %v3177_v23 }
 0x359   :  { %1697 = vmatmul.mubr.msk.bf16.gmra.mxu1 %vm299_vm2, %v983_v32  ;;  %v1983_v32 = vld [vmem:[#allocation3 + $0x60] sm:$0xff] }
 0x35a   :  { %1167 = vmatprep.mubr.bf16.mxu1 %v3177_v23 }
 0x361   :  { %1698 = vmatmul.mubr.msk.bf16.gmra.mxu1 %vm299_vm2, %v984_v17 }
 0x362   :  { %1177 = vmatprep.mubr.bf16.mxu1 %v3177_v23 }
 0x369   :  { %1699 = vmatmul.mubr.msk.bf16.gmra.mxu1 %vm299_vm2, %v985_v4 }
 0x36a   :  { %1187 = vmatprep.mubr.bf16.mxu1 %v3177_v23 }
 0x371   :  { %1700 = vmatmul.mubr.msk.bf16.gmra.mxu1 %vm299_vm2, %v986_v16 }
 0x372   :  { %1197 = vmatprep.mubr.bf16.mxu1 %v3177_v23 }
 0x379   :  { %1701 = vmatmul.mubr.msk.bf16.gmra.mxu1 %vm299_vm2, %v987_v46 }
 0x37a   :  { %1207 = vmatprep.mubr.bf16.mxu1 %v3177_v23 }
 0x381   :  { %1702 = vmatmul.mubr.msk.bf16.gmra.mxu1 %vm299_vm2, %v988_v36 }
 0x382   :  { %1217 = vmatprep.mubr.bf16.mxu1 %v3177_v23 }
 0x389   :  { %1703 = vmatmul.mubr.msk.bf16.gmra.mxu1 %vm299_vm2, %v989_v52 }
 0x38a   :  { %1227 = vmatprep.mubr.bf16.mxu1 %v3177_v23 }
 0x391   :  { %1704 = vmatmul.mubr.msk.bf16.gmra.mxu1 %vm299_vm2, %v990_v7  ;;  %v1984_v7 = vld [vmem:[#allocation3 + $0x8] sm:$0xff] }
 0x3c1   :  { %v879_v54 = vpop.f32.mrf.mxu1 }
 0x3c3   :  { %v881_v15 = vpop.f32.mrf.mxu1 }
 0x3c5   :  { %v883_v48 = vpop.f32.mrf.mxu1 }
 0x3c7   :  { %v885_v47 = vpop.f32.mrf.mxu1 }
 0x3c9   :  { %v889_v44 = vpop.f32.mrf.mxu1 }
 0x3cb   :  { %v891_v57 = vpop.f32.mrf.mxu1 }
 0x3cd   :  { %v893_v38 = vpop.f32.mrf.mxu1 }
 0x3cf   :  { %v895_v34 = vpop.f32.mrf.mxu1 }
 0x3d1   :  { %v899_v58 = vpop.f32.mrf.mxu1 }
 0x3d2   :  { %1844 = vrcp.f32 %v899_v58 }
 0x3d3   :  { %v901_v11 = vpop.f32.mrf.mxu1 }
 0x3d4   :  { %1846 = vrcp.f32 %v901_v11 }
 0x3d5   :  { %v903_v20 = vpop.f32.mrf.mxu1 }
 0x3d7   :  { %v904_v3 = vpop.f32.mrf.mxu1 }
 0x3d9   :  { %v2616_v37 = vpop.f32.mrf.mxu1 }
 0x3da   :  { %3185 = vst [vmem:[#allocation36_spill] sm:$0xff] %v2616_v37 }
 0x3db   :  { %v2618_v41 = vpop.f32.mrf.mxu1 }
 0x3dd   :  { %v2622_v39 = vpop.f32.mrf.mxu1 }
 0x3de   :  { %3187 = vst [vmem:[#allocation33_spill] sm:$0xff] %v2622_v39 }
 0x3df   :  { %v1845_v31 = vpop.eup %1844  ;;  %v2624_v26 = vpop.f32.mrf.mxu1 }
 0x3e0   :  { %v911_v12 = vrot.slane %v1845_v31, %v2620_v63 }
 0x3e1   :  { %v1847_v18 = vpop.eup %1846  ;;  %v2632_v14 = vpop.f32.mrf.mxu1 }
 0x3e2   :  { %v916_v40 = vmul.f32 %v911_v12, %v879_v54  ;;  %v918_v21 = vmul.f32 %v911_v12, %v883_v48  ;;  %v920_v45 = vmul.f32 %v911_v12, %v889_v44  ;;  %v922_v28 = vmul.f32 %v911_v12, %v893_v38 }
 0x3e3   :  { %v915_v55 = vrot.slane %v1847_v18, %v2620_v63  ;;  %v2635_v59 = vpop.f32.mrf.mxu1  ;;  %v1238_v24 = vmax.f32 %v2616_v37, %v2632_v14 }
 0x3e4   :  { %3189 = vst [vmem:[#allocation29_spill] sm:$0xff] %v2635_v59  ;;  %v925_v9 = vmul.f32 %v2630_v25, %v916_v40  ;;  %v927_v23 = vmul.f32 %v2630_v25, %v918_v21  ;;  %v929_v1 = vmul.f32 %v2630_v25, %v920_v45  ;;  %v931_v53 = vmul.f32 %v2630_v25, %v922_v28 }
 0x3e5   :  { %v917_v19 = vmul.f32 %v915_v55, %v881_v15  ;;  %v919_v22 = vmul.f32 %v915_v55, %v885_v47  ;;  %v921_v35 = vmul.f32 %v915_v55, %v891_v57  ;;  %v923_v61 = vmul.f32 %v915_v55, %v895_v34  ;;  %v2641_v42 = vpop.f32.mrf.mxu1  ;;  %v1985_v15 = vld [vmem:[#allocation3 + $0x28] sm:$0xff] }
 0x3e6   :  { %3190 = vst [vmem:[#allocation30_spill] sm:$0xff] %v2641_v42  ;;  %v933_v10 = vadd.f32 %v1980_v6, %v925_v9  ;;  %v935_v50 = vadd.f32 %v1981_v30, %v927_v23  ;;  %v937_v51 = vadd.f32 %v1982_v13, %v929_v1  ;;  %v939_v17 = vadd.f32 %v1983_v32, %v931_v53  ;;  %v1986_v47 = vld [vmem:[#allocation3 + $0x48] sm:$0xff] }
 0x3e7   :  { %v926_v4 = vmul.f32 %v2630_v25, %v917_v19  ;;  %v928_v16 = vmul.f32 %v2630_v25, %v919_v22  ;;  %v930_v46 = vmul.f32 %v2630_v25, %v921_v35  ;;  %v932_v36 = vmul.f32 %v2630_v25, %v923_v61  ;;  %v2647_v52 = vpop.f32.mrf.mxu1  ;;  %v1987_v57 = vld [vmem:[#allocation3 + $0x68] sm:$0xff] }
 0x3e8   :  { %3191 = vst [vmem:[#allocation26_spill] sm:$0xff] %v2647_v52  ;;  %941 = vst [vmem:[#allocation6] sm:$0xff] %v933_v10  ;;  %v1239_v25 = vmax.f32 %v2622_v39, %v2641_v42  ;;  %v1276_v42 = vmax.f32 %v2624_v26, %v2647_v52 }
 0x3e9   :  { %943 = vst [vmem:[#allocation6 + $0x10] sm:$0xff] %v935_v50  ;;  %945 = vst [vmem:[#allocation6 + $0x20] sm:$0xff] %v937_v51  ;;  %v934_v54 = vadd.f32 %v1984_v7, %v926_v4  ;;  %v936_v48 = vadd.f32 %v1985_v15, %v928_v16  ;;  %v938_v44 = vadd.f32 %v1986_v47, %v930_v46  ;;  %v2649_v34 = vpop.f32.mrf.mxu1 }
 0x3ea   :  { %947 = vst [vmem:[#allocation6 + $0x30] sm:$0xff] %v939_v17  ;;  %v940_v38 = vadd.f32 %v1987_v57, %v932_v36  ;;  %v1240_v62 = vmax.f32 %v1238_v24, %v2649_v34 }
 0x3eb   :  { %942 = vst [vmem:[#allocation6 + $0x8] sm:$0xff] %v934_v54  ;;  %944 = vst [vmem:[#allocation6 + $0x18] sm:$0xff] %v936_v48  ;;  %v2651_v58 = vpop.f32.mrf.mxu1 }
 0x3ec   :  { %946 = vst [vmem:[#allocation6 + $0x28] sm:$0xff] %v938_v44  ;;  %948 = vst [vmem:[#allocation6 + $0x38] sm:$0xff] %v940_v38 }
 0x3ed   :  { %v2653_v11 = vpop.f32.mrf.mxu1 }
 0x3ee   :  { %3192 = vst [vmem:[#allocation28_spill] sm:$0xff] %v2653_v11  ;;  %v1241_v0 = vmax.f32 %v1239_v25, %v2653_v11 }
 0x3ef   :  { %v2655_v56 = vpop.f32.mrf.mxu1 }
 0x3f0   :  { %3193 = vst [vmem:[#allocation25_spill] sm:$0xff] %v2655_v56  ;;  %v1278_v24 = vmax.f32 %v1276_v42, %v2655_v56 }
 0x3f1   :  { %v2657_v20 = vpop.f32.mrf.mxu1 }
 0x3f2   :  { %v1242_v49 = vmax.f32 %v1240_v62, %v2657_v20 }
 0x3f3   :  { %v2659_v3 = vpop.f32.mrf.mxu1 }
 0x3f5   :  { %v2661_v27 = vpop.f32.mrf.mxu1 }
 0x3f6   :  { %3194 = vst [vmem:[#allocation27_spill] sm:$0xff] %v2661_v27  ;;  %v1243_v29 = vmax.f32 %v1241_v0, %v2661_v27  ;;  %v1275_v0 = vmax.f32 %v2618_v41, %v2635_v59 }
 0x3f7   :  { %v2663_v31 = vpop.f32.mrf.mxu1 }
 0x3f8   :  { %v1280_v27 = vmax.f32 %v1278_v24, %v2663_v31 }
 0x3f9   :  { %v2665_v12 = vpop.f32.mrf.mxu1 }
 0x3fa   :  { %v1244_v37 = vmax.f32 %v1242_v49, %v2665_v12 }
 0x3fb   :  { %v2667_v18 = vpop.f32.mrf.mxu1 }
 0x3fd   :  { %v2669_v40 = vpop.f32.mrf.mxu1 }
 0x3fe   :  { %3195 = vst [vmem:[#allocation17_spill] sm:$0xff] %v2669_v40  ;;  %v1245_v8 = vmax.f32 %v1243_v29, %v2669_v40  ;;  %v1277_v40 = vmax.f32 %v1275_v0, %v2651_v58 }
 0x3ff   :  { %v2671_v21 = vpop.f32.mrf.mxu1 }
 0x400   :  { %v1282_v59 = vmax.f32 %v1280_v27, %v2671_v21 }
 0x401   :  { %v2673_v45 = vpop.f32.mrf.mxu1 }
 0x402   :  { %v1246_v62 = vmax.f32 %v1244_v37, %v2673_v45 }
 0x403   :  { %v2675_v28 = vpop.f32.mrf.mxu1 }
 0x405   :  { %v2677_v55 = vpop.f32.mrf.mxu1 }
 0x406   :  { %3196 = vst [vmem:[#allocation18_spill] sm:$0xff] %v2677_v55  ;;  %v1247_v25 = vmax.f32 %v1245_v8, %v2677_v55  ;;  %v1279_v55 = vmax.f32 %v1277_v40, %v2659_v3 }
 0x407   :  { %v2679_v9 = vpop.f32.mrf.mxu1 }
 0x408   :  { %v1284_v0 = vmax.f32 %v1282_v59, %v2679_v9 }
 0x409   :  { %v2681_v23 = vpop.f32.mrf.mxu1 }
 0x40a   :  { %v1248_v52 = vmax.f32 %v1246_v62, %v2681_v23 }
 0x40b   :  { %v2683_v1 = vpop.f32.mrf.mxu1 }
 0x40d   :  { %v2685_v53 = vpop.f32.mrf.mxu1 }
 0x40e   :  { %v1249_v29 = vmax.f32 %v1247_v25, %v2685_v53  ;;  %v1281_v25 = vmax.f32 %v1279_v55, %v2667_v18 }
 0x40f   :  { %v2687_v19 = vpop.f32.mrf.mxu1 }
 0x410   :  { %v1286_v40 = vmax.f32 %v1284_v0, %v2687_v19 }
 0x411   :  { %v2689_v22 = vpop.f32.mrf.mxu1 }
 0x412   :  { %v1250_v42 = vmax.f32 %v1248_v52, %v2689_v22 }
 0x413   :  { %v2691_v35 = vpop.f32.mrf.mxu1 }
 0x415   :  { %v2693_v61 = vpop.f32.mrf.mxu1 }
 0x416   :  { %v1251_v49 = vmax.f32 %v1249_v29, %v2693_v61  ;;  %v1283_v29 = vmax.f32 %v1281_v25, %v2675_v28 }
 0x417   :  { %v2695_v6 = vpop.f32.mrf.mxu1 }
 0x418   :  { %v1288_v55 = vmax.f32 %v1286_v40, %v2695_v6 }
 0x419   :  { %v2697_v10 = vpop.f32.mrf.mxu1 }
 0x41a   :  { %3197 = vst [vmem:[#allocation10_spill] sm:$0xff] %v2697_v10  ;;  %v1252_v24 = vmax.f32 %v1250_v42, %v2697_v10 }
 0x41b   :  { %v2699_v30 = vpop.f32.mrf.mxu1 }
 0x41c   :  { %3198 = vst [vmem:[#allocation9_spill] sm:$0xff] %v2699_v30 }
 0x41d   :  { %v2701_v50 = vpop.f32.mrf.mxu1 }
 0x41e   :  { %3199 = vst [vmem:[#allocation14_spill] sm:$0xff] %v2701_v50  ;;  %v1253_v37 = vmax.f32 %v1251_v49, %v2701_v50  ;;  %v1285_v49 = vmax.f32 %v1283_v29, %v2683_v1 }
 0x41f   :  { %v2703_v13 = vpop.f32.mrf.mxu1 }
 0x420   :  { %3200 = vst [vmem:[#allocation12_spill] sm:$0xff] %v2703_v13  ;;  %v1290_v25 = vmax.f32 %v1288_v55, %v2703_v13 }
 0x421   :  { %v2705_v51 = vpop.f32.mrf.mxu1 }
 0x422   :  { %3201 = vst [vmem:[#allocation16_spill] sm:$0xff] %v2705_v51  ;;  %v1254_v27 = vmax.f32 %v1252_v24, %v2705_v51 }
 0x423   :  { %v2707_v32 = vpop.f32.mrf.mxu1 }
 0x425   :  { %v2709_v17 = vpop.f32.mrf.mxu1 }
 0x426   :  { %3202 = vst [vmem:[#allocation13_spill] sm:$0xff] %v2709_v17  ;;  %v1255_v62 = vmax.f32 %v1253_v37, %v2709_v17  ;;  %v1287_v37 = vmax.f32 %v1285_v49, %v2691_v35 }
 0x427   :  { %v2711_v4 = vpop.f32.mrf.mxu1 }
 0x428   :  { %3203 = vst [vmem:[#allocation11_spill] sm:$0xff] %v2711_v4  ;;  %v1292_v29 = vmax.f32 %v1290_v25, %v2711_v4 }
 0x429   :  { %v2713_v16 = vpop.f32.mrf.mxu1 }
 0x42a   :  { %3204 = vst [vmem:[#allocation15_spill] sm:$0xff] %v2713_v16  ;;  %v1256_v59 = vmax.f32 %v1254_v27, %v2713_v16  ;;  %v3206_v16 = vld [vmem:[#allocation30_spill] sm:$0xff] }
 0x42b   :  { %v2715_v46 = vpop.f32.mrf.mxu1 }
 0x42d   :  { %v2717_v36 = vpop.f32.mrf.mxu1 }
 0x42e   :  { %3205 = vst [vmem:[#allocation37_spill] sm:$0xff] %v2717_v36  ;;  %v1257_v52 = vmax.f32 %v1255_v62, %v2717_v36  ;;  %v1289_v62 = vmax.f32 %v1287_v37, %v2699_v30 }
 0x42f   :  { %v2719_v7 = vpop.f32.mrf.mxu1 }
 0x430   :  { %v1294_v49 = vmax.f32 %v1292_v29, %v2719_v7 }
 0x431   :  { %v2721_v54 = vpop.f32.mrf.mxu1 }
 0x432   :  { %v1258_v0 = vmax.f32 %v1256_v59, %v2721_v54 }
 0x433   :  { %v2723_v15 = vpop.f32.mrf.mxu1 }
 0x435   :  { %v2725_v48 = vpop.f32.mrf.mxu1 }
 0x436   :  { %v1259_v42 = vmax.f32 %v1257_v52, %v2725_v48  ;;  %v1291_v52 = vmax.f32 %v1289_v62, %v2707_v32 }
 0x437   :  { %v2727_v47 = vpop.f32.mrf.mxu1 }
 0x438   :  { %v1296_v37 = vmax.f32 %v1294_v49, %v2727_v47 }
 0x439   :  { %v2729_v44 = vpop.f32.mrf.mxu1 }
 0x43a   :  { %v1260_v40 = vmax.f32 %v1258_v0, %v2729_v44 }
 0x43b   :  { %v2731_v57 = vpop.f32.mrf.mxu1 }
 0x43d   :  { %v2733_v38 = vpop.f32.mrf.mxu1 }
 0x43e   :  { %v1261_v24 = vmax.f32 %v1259_v42, %v2733_v38  ;;  %v1293_v42 = vmax.f32 %v1291_v52, %v2715_v46 }
 0x43f   :  { %v2735_v5 = vpop.f32.mrf.mxu1 }
 0x440   :  { %v1298_v13 = vmax.f32 %v1296_v37, %v2735_v5 }
 0x441   :  { %v2737_v2 = vpop.f32.mrf.mxu1 }
 0x442   :  { %v1262_v55 = vmax.f32 %v1260_v40, %v2737_v2 }
 0x443   :  { %v2739_v33 = vpop.f32.mrf.mxu1 }
 0x445   :  { %v2743_v63 = vpop.f32.mrf.mxu1 }
 0x446   :  { %v1263_v27 = vmax.f32 %v1261_v24, %v2743_v63  ;;  %v1295_v24 = vmax.f32 %v1293_v42, %v2723_v15 }
 0x447   :  { %v2748_v60 = vpop.f32.mrf.mxu1 }
 0x448   :  { %v1297_v29 = vmax.f32 %v1295_v24, %v2731_v57  ;;  %v1300_v40 = vmax.f32 %v1298_v13, %v2748_v60 }
 0x449   :  { %v2752_v43 = vpop.f32.mrf.mxu1 }
 0x44a   :  { %v1264_v25 = vmax.f32 %v1262_v55, %v2752_v43  ;;  %v1299_v52 = vmax.f32 %v1297_v29, %v2739_v33 }
 0x44b   :  { %v2756_v39 = vpop.f32.mrf.mxu1 }
 0x44c   :  { %v1301_v55 = vmax.f32 %v1299_v52, %v2756_v39 }
 0x44d   :  { %v2762_v11 = vpop.f32.mrf.mxu1 }
 0x44e   :  { %v1265_v59 = vmax.f32 %v1263_v27, %v2762_v11 }
 0x44f   :  { %v2773_v8 = vpop.f32.mrf.mxu1 }
 0x450   :  { %v1302_v49 = vmax.f32 %v1300_v40, %v2773_v8 }
 0x451   :  { %v2783_v56 = vpop.f32.mrf.mxu1 }
 0x452   :  { %v1266_v62 = vmax.f32 %v1264_v25, %v2783_v56 }
 0x453   :  { %v2793_v50 = vpop.f32.mrf.mxu1 }
 0x454   :  { %v1303_v37 = vmax.f32 %v1301_v55, %v2793_v50  ;;  %v3207_v55 = vld [vmem:[#allocation28_spill] sm:$0xff] }
 0x455   :  { %v2803_v10 = vpop.f32.mrf.mxu1 }
 0x456   :  { %v1267_v0 = vmax.f32 %v1265_v59, %v2803_v10 }
 0x457   :  { %v2818_v27 = vpop.f32.mrf.mxu1 }
 0x458   :  { %v1268_v17 = vmax.f32 %v1266_v62, %v1267_v0  ;;  %v1304_v42 = vmax.f32 %v1302_v49, %v2818_v27 }
 0x45a   :  { %v1269_v59 = vrot.slane %v1268_v17, 4  ;;  %v1305_v25 = vmax.f32 %v1303_v37, %v1304_v42  ;;  %v3208_v42 = vld [vmem:[#allocation27_spill] sm:$0xff] }
 0x45c   :  { %v1270_v51 = vmax.f32 %v1268_v17, %v1269_v59  ;;  %v1306_v24 = vrot.slane %v1305_v25, 4 }
 0x45e   :  { %v1271_v30 = vrot.slane %v1270_v51, 2  ;;  %v1307_v13 = vmax.f32 %v1305_v25, %v1306_v24  ;;  %v3209_v24 = vld [vmem:[#allocation17_spill] sm:$0xff] }
 0x460   :  { %v1272_v4 = vmax.f32 %v1270_v51, %v1271_v30  ;;  %v1308_v62 = vrot.slane %v1307_v13, 2 }
 0x462   :  { %v1273_v0 = vrot.slane %v1272_v4, 1  ;;  %v1309_v29 = vmax.f32 %v1307_v13, %v1308_v62 }
 0x464   :  { %v2825_v36 = vmax.f32 %v1272_v4, %v1273_v0  ;;  %v1310_v52 = vrot.slane %v1309_v29, 1 }
 0x466   :  { %v1316_v40 = vsub.f32 %v2632_v14, %v2825_v36  ;;  %v1318_v49 = vsub.f32 %v3206_v16, %v2825_v36  ;;  %v1320_v17 = vsub.f32 %v2649_v34, %v2825_v36  ;;  %v1322_v59 = vsub.f32 %v3207_v55, %v2825_v36 }
 0x467   :  { %v1324_v30 = vsub.f32 %v2657_v20, %v2825_v36  ;;  %v2837_v51 = vmax.f32 %v1309_v29, %v1310_v52  ;;  %v1326_v37 = vsub.f32 %v3208_v42, %v2825_v36  ;;  %v1328_v25 = vsub.f32 %v2665_v12, %v2825_v36 }
 0x468   :  { %v1384_v4 = vmul.f32 1.442695, %v1316_v40  ;;  %v1388_v14 = vmul.f32 1.442695, %v1318_v49  ;;  %v1392_v16 = vmul.f32 1.442695, %v1320_v17  ;;  %v1330_v34 = vsub.f32 %v3209_v24, %v2825_v36 }
 0x469   :  { %v1396_v13 = vmul.f32 1.442695, %v1322_v59  ;;  %v1313_v0 = vsub.f32 %v2618_v41, %v2837_v51  ;;  %v1400_v62 = vmul.f32 1.442695, %v1324_v30  ;;  %v1315_v20 = vsub.f32 %v2624_v26, %v2837_v51 }
 0x46a   :  { %1848 = vpow2.f32 %v1384_v4  ;;  %v1404_v29 = vmul.f32 1.442695, %v1326_v37  ;;  %v1337_v40 = vsub.f32 %v2683_v1, %v2837_v51  ;;  %v1408_v52 = vmul.f32 1.442695, %v1328_v25 }
 0x46b   :  { %1850 = vpow2.f32 %v1388_v14  ;;  %v1339_v12 = vsub.f32 %v2687_v19, %v2837_v51  ;;  %v1412_v49 = vmul.f32 1.442695, %v1330_v34  ;;  %v1340_v41 = vsub.f32 %v2689_v22, %v2825_v36  ;;  %v3210_v34 = vld [vmem:[#allocation18_spill] sm:$0xff] }
 0x46c   :  { %1852 = vpow2.f32 %v1392_v16  ;;  %v1378_v17 = vmul.f32 1.442695, %v1313_v0  ;;  %v1341_v26 = vsub.f32 %v2691_v35, %v2837_v51  ;;  %v1382_v55 = vmul.f32 1.442695, %v1315_v20 }
 0x46d   :  { %1854 = vpow2.f32 %v1396_v13  ;;  %v1342_v1 = vsub.f32 %v2693_v61, %v2825_v36  ;;  %v1426_v59 = vmul.f32 1.442695, %v1337_v40  ;;  %v1343_v19 = vsub.f32 %v2695_v6, %v2837_v51 }
 0x46e   :  { %1856 = vpow2.f32 %v1400_v62  ;;  %v1430_v30 = vmul.f32 1.442695, %v1339_v12  ;;  %v1333_v22 = vsub.f32 %v2675_v28, %v2837_v51  ;;  %v1432_v4 = vmul.f32 1.442695, %v1340_v41  ;;  %v3212_v12 = vld [vmem:[#allocation26_spill] sm:$0xff] }
 0x46f   :  { %1858 = vpow2.f32 %v1404_v29  ;;  %v1336_v35 = vsub.f32 %v2681_v23, %v2825_v36  ;;  %v1434_v42 = vmul.f32 1.442695, %v1341_v26  ;;  %v1338_v61 = vsub.f32 %v2685_v53, %v2825_v36 }
 0x470   :  { %1860 = vpow2.f32 %v1408_v52  ;;  %v1436_v37 = vmul.f32 1.442695, %v1342_v1  ;;  %v1335_v6 = vsub.f32 %v2679_v9, %v2837_v51  ;;  %v1438_v14 = vmul.f32 1.442695, %v1343_v19 }
 0x471   :  { %1862 = vpow2.f32 %v1412_v49  ;;  %v1329_v28 = vsub.f32 %v2667_v18, %v2837_v51  ;;  %v1418_v25 = vmul.f32 1.442695, %v1333_v22  ;;  %v1332_v23 = vsub.f32 %v2673_v45, %v2825_v36  ;;  %v3211_v45 = vld [vmem:[#allocation29_spill] sm:$0xff] }
 0x472   :  { %1864 = vpow2.f32 %v1378_v17  ;;  %v1424_v24 = vmul.f32 1.442695, %v1336_v35  ;;  %v1334_v13 = vsub.f32 %v3210_v34, %v2825_v36  ;;  %v1428_v9 = vmul.f32 1.442695, %v1338_v61 }
 0x473   :  { %1866 = vpow2.f32 %v1382_v55  ;;  %v1331_v18 = vsub.f32 %v2671_v21, %v2837_v51  ;;  %v1422_v62 = vmul.f32 1.442695, %v1335_v6  ;;  %v1317_v29 = vsub.f32 %v3211_v45, %v2837_v51  ;;  %v3213_v6 = vld [vmem:[#allocation25_spill] sm:$0xff] }
 0x474   :  { %1868 = vpow2.f32 %v1426_v59  ;;  %v1410_v40 = vmul.f32 1.442695, %v1329_v28  ;;  %v1319_v49 = vsub.f32 %v3212_v12, %v2837_v51  ;;  %v1416_v41 = vmul.f32 1.442695, %v1332_v23 }
 0x475   :  { %1870 = vpow2.f32 %v1430_v30  ;;  %v1325_v21 = vsub.f32 %v2659_v3, %v2837_v51  ;;  %v1420_v26 = vmul.f32 1.442695, %v1334_v13  ;;  %v1327_v1 = vsub.f32 %v2663_v31, %v2837_v51 }
 0x476   :  { %1872 = vpow2.f32 %v1432_v4  ;;  %v1414_v59 = vmul.f32 1.442695, %v1331_v18  ;;  %v1356_v30 = vsub.f32 %v2721_v54, %v2825_v36  ;;  %v1386_v22 = vmul.f32 1.442695, %v1317_v29 }
 0x477   :  { %v2871_v16 = vpop.eup %1848  ;;  %1874 = vpow2.f32 %v1434_v42  ;;  %v1321_v3 = vsub.f32 %v2651_v58, %v2837_v51  ;;  %v1390_v35 = vmul.f32 1.442695, %v1319_v49  ;;  %v1358_v31 = vsub.f32 %v2725_v48, %v2825_v36 }
 0x478   :  { %v2875_v53 = vpop.eup %1850  ;;  %1876 = vpow2.f32 %v1436_v37  ;;  %v1402_v61 = vmul.f32 1.442695, %v1325_v21  ;;  %v1323_v54 = vsub.f32 %v3213_v6, %v2837_v51  ;;  %v1464_v58 = vmul.f32 1.442695, %v1356_v30 }
 0x479   :  { %v2879_v0 = vpop.eup %1852  ;;  %1878 = vpow2.f32 %v1438_v14  ;;  %v1406_v14 = vmul.f32 1.442695, %v1327_v1  ;;  %v1394_v48 = vmul.f32 1.442695, %v1321_v3  ;;  %v1362_v13 = vsub.f32 %v2733_v38, %v2825_v36 }
 0x47a   :  { %v2883_v20 = vpop.eup %1854  ;;  %1880 = vpow2.f32 %v1418_v25  ;;  %v1360_v25 = vsub.f32 %v2729_v44, %v2825_v36  ;;  %v1398_v45 = vmul.f32 1.442695, %v1323_v54  ;;  %v1364_v29 = vsub.f32 %v2737_v2, %v2825_v36 }
 0x47b   :  { %v2887_v52 = vpop.eup %1856  ;;  %1882 = vpow2.f32 %v1424_v24  ;;  %v1361_v24 = vsub.f32 %v2731_v57, %v2837_v51  ;;  %v1365_v12 = vsub.f32 %v2739_v33, %v2837_v51  ;;  %v1366_v21 = vsub.f32 %v2743_v63, %v2825_v36  ;;  %v3214_v63 = vld [vmem:[#allocation36_spill] sm:$0xff] }
 0x47c   :  { %v2891_v17 = vpop.eup %1858  ;;  %1884 = vpow2.f32 %v1428_v9  ;;  %v1468_v9 = vmul.f32 1.442695, %v1358_v31  ;;  %v1367_v2 = vsub.f32 %v2748_v60, %v2837_v51  ;;  %v1374_v33 = vsub.f32 %v2803_v10, %v2825_v36  ;;  %v3215_v60 = vld [vmem:[#allocation33_spill] sm:$0xff] }
 0x47d   :  { %v2895_v55 = vpop.eup %1860  ;;  %1886 = vpow2.f32 %v1422_v62  ;;  %v1363_v62 = vsub.f32 %v2735_v5, %v2837_v51  ;;  %v1474_v38 = vmul.f32 1.442695, %v1361_v24  ;;  %v1476_v5 = vmul.f32 1.442695, %v1362_v13 }
 0x47e   :  { %v2899_v19 = vpop.eup %1862  ;;  %1888 = vpow2.f32 %v1410_v40  ;;  %v1472_v40 = vmul.f32 1.442695, %v1360_v25  ;;  %v1480_v3 = vmul.f32 1.442695, %v1364_v29  ;;  %v1312_v31 = vsub.f32 %v3214_v63, %v2825_v36 }
 0x47f   :  { %v2903_v4 = vpop.eup %1864  ;;  %1890 = vpow2.f32 %v1416_v41  ;;  %v1314_v54 = vsub.f32 %v3215_v60, %v2825_v36  ;;  %v1375_v10 = vsub.f32 %v2818_v27, %v2837_v51  ;;  %v1486_v25 = vmul.f32 1.442695, %v1367_v2 }
 0x480   :  { %v2907_v42 = vpop.eup %1866  ;;  %1892 = vpow2.f32 %v1420_v26  ;;  %v1500_v24 = vmul.f32 1.442695, %v1374_v33  ;;  %v1373_v13 = vsub.f32 %v2793_v50, %v2837_v51  ;;  %v1372_v27 = vsub.f32 %v2783_v56, %v2825_v36 }
 0x481   :  { %v1869_v37 = vpop.eup %1868  ;;  %1894 = vpow2.f32 %v1414_v59  ;;  %v1478_v59 = vmul.f32 1.442695, %v1363_v62  ;;  %v1380_v62 = vmul.f32 1.442695, %v1314_v54  ;;  %v1502_v29 = vmul.f32 1.442695, %v1375_v10 }
 0x482   :  { %v1871_v28 = vpop.eup %1870  ;;  %1896 = vpow2.f32 %v1386_v22  ;;  %v1498_v56 = vmul.f32 1.442695, %v1373_v13  ;;  %v1359_v60 = vsub.f32 %v2727_v47, %v2837_v51  ;;  %v1506_v47 = vpack.c.bf16 %v2875_v53, %v2871_v16  ;;  %v3217_v16 = vld [vmem:[#allocation37_spill] sm:$0xff] }
 0x483   :  { %v1873_v23 = vpop.eup %1872  ;;  %1898 = vpow2.f32 %v1390_v35  ;;  %v1517_v30 = vpack.c.bf16 %v1871_v28, %v1869_v37  ;;  %v1354_v53 = vsub.f32 %v3217_v16, %v2825_v36  ;;  %v3231_v16 = vld [vmem:[#allocation20_spill] sm:$0xff] }
 0x484   :  { %v1875_v34 = vpop.eup %1874  ;;  %1900 = vpow2.f32 %v1402_v61  ;;  %v1482_v61 = vmul.f32 1.442695, %v1365_v12 }
 0x485   :  { %v1877_v18 = vpop.eup %1876  ;;  %1902 = vpow2.f32 %v1406_v14  ;;  %v1484_v14 = vmul.f32 1.442695, %v1366_v21  ;;  %v1496_v21 = vmul.f32 1.442695, %v1372_v27 }
 0x486   :  { %v1879_v44 = vpop.eup %1878  ;;  %1904 = vpow2.f32 %v1464_v58  ;;  %v1518_v26 = vpack.c.bf16 %v1877_v18, %v1873_v23 }
 0x487   :  { %v1881_v57 = vpop.eup %1880  ;;  %1906 = vpow2.f32 %v1394_v48  ;;  %v1519_v49 = vpack.c.bf16 %v1879_v44, %v1875_v34  ;;  %v1369_v48 = vsub.f32 %v2756_v39, %v2837_v51  ;;  %v1371_v39 = vsub.f32 %v2773_v8, %v2837_v51 }
 0x488   :  { %v1883_v41 = vpop.eup %1882  ;;  %1908 = vpow2.f32 %v1468_v9  ;;  %v1376_v9 = vmul.f32 1.442695, %v1312_v31  ;;  %v1512_v8 = vpack.c.bf16 %v2899_v19, %v2895_v55  ;;  %v1510_v55 = vpack.c.bf16 %v2891_v17, %v2887_v52 }
 0x489   :  { %v1885_v1 = vpop.eup %1884  ;;  %1910 = vpow2.f32 %v1398_v45  ;;  %1536 = vmatprep.subr.bf16.mxu0 %v1519_v49  ;;  %v1490_v50 = vmul.f32 1.442695, %v1369_v48  ;;  %v1357_v52 = vsub.f32 %v2723_v15, %v2837_v51  ;;  %v1508_v17 = vpack.c.bf16 %v2883_v20, %v2879_v0 }
 0x48a   :  { %v1887_v22 = vpop.eup %1886  ;;  %1912 = vpow2.f32 %v1472_v40  ;;  %1537 = vmatpush1.bf16.msra.mxu0 %v1518_v26  ;;  %v1516_v37 = vpack.c.bf16 %v1885_v1, %v1883_v41  ;;  %v1370_v41 = vsub.f32 %v2762_v11, %v2825_v36  ;;  %v1494_v26 = vmul.f32 1.442695, %v1371_v39 }
 0x48b   :  { %v1889_v35 = vpop.eup %1888  ;;  %1914 = vpow2.f32 %v1474_v38  ;;  %1538 = vmatprep.subr.bf16.mxu0 %v1517_v30  ;;  %v1515_v58 = vpack.c.bf16 %v1887_v22, %v1881_v57  ;;  %v1368_v38 = vsub.f32 %v2752_v43, %v2825_v36  ;;  %v1353_v0 = vsub.f32 %v2715_v46, %v2837_v51  ;;  %v3216_v46 = vld [vmem:[#allocation15_spill] sm:$0xff] }
 0x48c   :  { %v1891_v6 = vpop.eup %1890  ;;  %1916 = vpow2.f32 %v1476_v5  ;;  %v1492_v22 = vmul.f32 1.442695, %v1370_v41  ;;  %v1466_v20 = vmul.f32 1.442695, %v1357_v52 }
 0x48d   :  { %v1893_v28 = vpop.eup %1892  ;;  %1918 = vpow2.f32 %v1478_v59  ;;  %v1488_v30 = vmul.f32 1.442695, %v1368_v38  ;;  %v1458_v27 = vmul.f32 1.442695, %v1353_v0 }
 0x48e   :  { %v1895_v23 = vpop.eup %1894  ;;  %1920 = vpow2.f32 %v1480_v3  ;;  %1539 = vmatpush1.bf16.msra.mxu0 %v1516_v37  ;;  %v1514_v45 = vpack.c.bf16 %v1893_v28, %v1891_v6 }
 0x48f   :  { %v2939_v34 = vpop.eup %1896  ;;  %1922 = vpow2.f32 %v1482_v61  ;;  %1540 = vmatprep.subr.bf16.mxu0 %v1515_v58  ;;  %v1513_v40 = vpack.c.bf16 %v1895_v23, %v1889_v35  ;;  %v1355_v58 = vsub.f32 %v2719_v7, %v2837_v51  ;;  %v1470_v23 = vmul.f32 1.442695, %v1359_v60 }
 0x490   :  { %v1899_v18 = vpop.eup %1898  ;;  %1924 = vpow2.f32 %v1484_v14 }
 0x491   :  { %v1901_v44 = vpop.eup %1900  ;;  %1926 = vpow2.f32 %v1486_v25  ;;  %v1507_v54 = vpack.c.bf16 %v1899_v18, %v2939_v34  ;;  %v1349_v34 = vsub.f32 %v2707_v32, %v2837_v51 }
 0x492   :  { %v1903_v57 = vpop.eup %1902  ;;  %1928 = vpow2.f32 %v1500_v24  ;;  %1541 = vmatpush1.bf16.msra.mxu0 %v1514_v45  ;;  %v1505_v24 = vpack.c.bf16 %v2907_v42, %v2903_v4  ;;  %v3218_v4 = vld [vmem:[#allocation11_spill] sm:$0xff]  ;;  %v1462_v45 = vmul.f32 1.442695, %v1355_v58 }
 0x493   :  { %v2947_v12 = vpop.eup %1904  ;;  %1930 = vpow2.f32 %v1376_v9  ;;  %1542 = vmatprep.subr.bf16.mxu0 %v1513_v40  ;;  %v1511_v1 = vpack.c.bf16 %v1903_v57, %v1901_v44  ;;  %v1352_v9 = vsub.f32 %v3216_v46, %v2825_v36  ;;  %v1351_v42 = vsub.f32 %v3218_v4, %v2837_v51  ;;  %v3220_v57 = vld [vmem:[#allocation16_spill] sm:$0xff]  ;;  %v3225_v46 = vld [vmem:[#allocation34_spill] sm:$0xff]  ;;  %v3235_v4 = vld [vmem:[#allocation19_spill] sm:$0xff] }
 0x494   :  { %v1907_v49 = vpop.eup %1906  ;;  %1932 = vpow2.f32 %v1380_v62  ;;  %v1450_v40 = vmul.f32 1.442695, %v1349_v34 }
 0x495   :  { %v2955_v5 = vpop.eup %1908  ;;  %1934 = vpow2.f32 %v1502_v29  ;;  %v3219_v29 = vld [vmem:[#allocation9_spill] sm:$0xff]  ;;  %v1456_v38 = vmul.f32 1.442695, %v1352_v9  ;;  %v3229_v9 = vld [vmem:[#allocation24_spill] sm:$0xff] }
 0x496   :  { %v1911_v2 = vpop.eup %1910  ;;  %1936 = vpow2.f32 %v1490_v50  ;;  %1543 = vmatpush1.bf16.msra.mxu0 %v1512_v8  ;;  %v1526_v43 = vpack.c.bf16 %v2955_v5, %v2947_v12  ;;  %v1345_v39 = vsub.f32 %v3219_v29, %v2837_v51  ;;  %v1348_v50 = vsub.f32 %v3220_v57, %v2825_v36  ;;  %v3226_v12 = vld [vmem:[#allocation35_spill] sm:$0xff] }
 0x497   :  { %v2959_v59 = vpop.eup %1912  ;;  %1938 = vpow2.f32 %v1498_v56  ;;  %1544 = vmatprep.subr.bf16.mxu0 %v1511_v1  ;;  %v1509_v33 = vpack.c.bf16 %v1911_v2, %v1907_v49  ;;  %v3221_v49 = vld [vmem:[#allocation13_spill] sm:$0xff]  ;;  %v3222_v1 = vld [vmem:[#allocation12_spill] sm:$0xff]  ;;  %v3227_v5 = vpack.c.bf16 %v3225_v46, %v3226_v12 }
 0x498   :  { %v2961_v11 = vpop.eup %1914  ;;  %1940 = vpow2.f32 %v1496_v21  ;;  %v1350_v41 = vsub.f32 %v3221_v49, %v2825_v36  ;;  %v1460_v21 = vmul.f32 1.442695, %v1354_v53  ;;  %v1347_v2 = vsub.f32 %v3222_v1, %v2837_v51 }
 0x499   :  { %v2965_v19 = vpop.eup %1916  ;;  %1942 = vpow2.f32 %v1494_v26  ;;  %v1448_v52 = vmul.f32 1.442695, %v1348_v50  ;;  %v958_v53 = vpack.c.bf16 %v3231_v16, %v3231_v16 }
 0x49a   :  { %v2967_v3 = vpop.eup %1918  ;;  %1545 = vmatpush1.bf16.msra.mxu0 %v1510_v55  ;;  %v1528_v35 = vpack.c.bf16 %v2965_v19, %v2959_v59  ;;  %1944 = vpow2.f32 %v1488_v30  ;;  %v1454_v30 = vmul.f32 1.442695, %v1351_v42  ;;  %v1442_v55 = vmul.f32 1.442695, %v1345_v39 }
 0x49b   :  { %v2971_v63 = vpop.eup %1920  ;;  %1546 = vmatprep.subr.bf16.mxu0 %v1509_v33  ;;  %v1529_v31 = vpack.c.bf16 %v2967_v3, %v2961_v11  ;;  %1946 = vpow2.f32 %v1492_v22  ;;  %v3223_v33 = vld [vmem:[#allocation10_spill] sm:$0xff]  ;;  %v957_v42 = vpack.c.bf16 %v3235_v4, %v3235_v4 }
 0x49c   :  { %v2975_v61 = vpop.eup %1922  ;;  %1948 = vpow2.f32 %v1466_v20 }
 0x49d   :  { %v2981_v6 = vpop.eup %1924  ;;  %1950 = vpow2.f32 %v1470_v23 }
 0x49e   :  { %v2986_v14 = vpop.eup %1926  ;;  %1547 = vmatpush1.bf16.msra.mxu0 %v1508_v17  ;;  %v1530_v37 = vpack.c.bf16 %v2981_v6, %v2971_v63  ;;  %1952 = vpow2.f32 %v1458_v27  ;;  %v3224_v17 = vld [vmem:[#allocation14_spill] sm:$0xff]  ;;  %v3232_v27 = vld [vmem:[#allocation21_spill] sm:$0xff] }
 0x49f   :  { %v1929_v28 = vpop.eup %1928  ;;  %1548 = vmatprep.subr.bf16.mxu0 %v1507_v54  ;;  %v1531_v15 = vpack.c.bf16 %v2986_v14, %v2975_v61  ;;  %1954 = vpow2.f32 %v1462_v45  ;;  %v1344_v61 = vsub.f32 %v3223_v33, %v2825_v36  ;;  %v1346_v60 = vsub.f32 %v3224_v17, %v2825_v36 }
 0x4a0   :  { %v1931_v10 = vpop.eup %1930  ;;  %1956 = vpow2.f32 %v1450_v40  ;;  %v1452_v54 = vmul.f32 1.442695, %v1350_v41 }
 0x4a1   :  { %v1933_v25 = vpop.eup %1932  ;;  %1958 = vpow2.f32 %v1456_v38  ;;  %v1440_v51 = vmul.f32 1.442695, %v1344_v61  ;;  %v3237_v61 = vld [vmem:[#allocation31_spill] sm:$0xff] }
 0x4a2   :  { %v1935_v48 = vpop.eup %1934  ;;  %1549 = vmatpush1.bf16.msra.mxu0 %v1506_v47  ;;  %v1504_v7 = vpack.c.bf16 %v1933_v25, %v1931_v10  ;;  %1960 = vpow2.f32 %v1460_v21  ;;  %v1444_v10 = vmul.f32 1.442695, %v1346_v60 }
 0x4a3   :  { %v1937_v13 = vpop.eup %1936  ;;  %1550 = vmatprep.subr.bf16.mxu0 %v1505_v24  ;;  %1962 = vpow2.f32 %v1454_v30 }
 0x4a4   :  { %v1939_v18 = vpop.eup %1938  ;;  %1964 = vpow2.f32 %v1442_v55 }
 0x4a5   :  { %v1941_v62 = vpop.eup %1940  ;;  %v1535_v32 = vpack.c.bf16 %v1935_v48, %v1939_v18  ;;  %1966 = vpow2.f32 %v1448_v52 }
 0x4a6   :  { %v1943_v44 = vpop.eup %1942  ;;  %1551 = vmatpush1.bf16.msra.mxu0 %v1504_v7  ;;  %v1534_v8 = vpack.c.bf16 %v1929_v28, %v1941_v62  ;;  %v1446_v28 = vmul.f32 1.442695, %v1347_v2  ;;  %1968 = vpow2.f32 %v1452_v54  ;;  %v3233_v7 = vld [vmem:[#allocation23_spill] sm:$0xff] }
 0x4a7   :  { %1552 = vmatprep.subr.bf16.mxu0 %v1535_v32  ;;  %v1945_v56 = vpop.eup %1944  ;;  %v1533_v22 = vpack.c.bf16 %v1943_v44, %v1937_v13  ;;  %v3234_v62 = vpack.c.bf16 %v3232_v27, %v3233_v7 }
 0x4a8   :  { %v1947_v26 = vpop.eup %1946  ;;  %1970 = vpow2.f32 %v1446_v28 }
 0x4a9   :  { %v1532_v14 = vpack.c.bf16 %v1947_v26, %v1945_v56  ;;  %v1949_v0 = vpop.eup %1948  ;;  %1972 = vpow2.f32 %v1440_v51 }
 0x4aa   :  { %1553 = vmatpush2.bf16.msra.mxu0 %v1534_v8  ;;  %v1951_v20 = vpop.eup %1950  ;;  %1974 = vpow2.f32 %v1444_v10  ;;  %v3236_v8 = vld [vmem:[#allocation32_spill] sm:$0xff] }
 0x4ab   :  { %1554 = vmatprep.subr.bf16.mxu0 %v1533_v22  ;;  %v1953_v36 = vpop.eup %1952  ;;  %v1527_v47 = vpack.c.bf16 %v1951_v20, %v1949_v0  ;;  %v1988_v0 = vld [vmem:[#allocation3 + $0x10] sm:$0xff] }
 0x4ac   :  { %v1955_v25 = vpop.eup %1954 }
 0x4ad   :  { %v1525_v24 = vpack.c.bf16 %v1955_v25, %v1953_v36  ;;  %v1989_v36 = vld [vmem:[#allocation3 + $0x30] sm:$0xff] }
 0x4ae   :  { %1555 = vmatpush2.bf16.msra.mxu0 %v1532_v14  ;;  %v1990_v25 = vld [vmem:[#allocation3 + $0x50] sm:$0xff] }
 0x4af   :  { %1556 = vmatprep.subr.bf16.mxu0 %v1531_v15  ;;  %v1957_v15 = vpop.eup %1956 }
 0x4b0   :  { %v1959_v58 = vpop.eup %1958 }
 0x4b1   :  { %v1961_v23 = vpop.eup %1960 }
 0x4b2   :  { %1557 = vmatpush2.bf16.msra.mxu0 %v1530_v37  ;;  %v1963_v63 = vpop.eup %1962 }
 0x4b3   :  { %1558 = vmatprep.subr.bf16.mxu0 %v1529_v31  ;;  %v1965_v11 = vpop.eup %1964  ;;  %v1524_v31 = vpack.c.bf16 %v1961_v23, %v1959_v58  ;;  %v1523_v37 = vpack.c.bf16 %v1963_v63, %v1957_v15  ;;  %v1991_v58 = vld [vmem:[#allocation3 + $0x70] sm:$0xff] }
 0x4b4   :  { %v1967_v3 = vpop.eup %1966 }
 0x4b5   :  { %v1969_v6 = vpop.eup %1968 }
 0x4b6   :  { %1559 = vmatpush2.bf16.msra.mxu0 %v1528_v35  ;;  %v1971_v48 = vpop.eup %1970  ;;  %v1522_v19 = vpack.c.bf16 %v1969_v6, %v1967_v3 }
 0x4b7   :  { %1560 = vmatprep.subr.bf16.mxu0 %v1527_v47  ;;  %v1973_v59 = vpop.eup %1972  ;;  %v1521_v34 = vpack.c.bf16 %v1971_v48, %v1965_v11 }
 0x4b8   :  { %v1975_v35 = vpop.eup %1974 }
 0x4b9   :  { %v1520_v13 = vpack.c.bf16 %v1975_v35, %v1973_v59  ;;  %v1994_v59 = vld [vmem:[#allocation3 + $0x58] sm:$0xff] }
 0x4ba   :  { %1561 = vmatpush2.bf16.msra.mxu0 %v1526_v43  ;;  %v3228_v43 = vld [vmem:[#allocation22_spill] sm:$0xff]  ;;  %v1995_v35 = vld [vmem:[#allocation3 + $0x78] sm:$0xff] }
 0x4bb   :  { %1562 = vmatprep.subr.bf16.mxu0 %v1525_v24  ;;  %v3230_v18 = vpack.c.bf16 %v3228_v43, %v3229_v9 }
 0x4be   :  { %1563 = vmatpush2.bf16.msra.mxu0 %v1524_v31  ;;  %v1992_v31 = vld [vmem:[#allocation3 + $0x18] sm:$0xff] }
 0x4bf   :  { %1564 = vmatprep.subr.bf16.mxu0 %v1523_v37  ;;  %v1993_v37 = vld [vmem:[#allocation3 + $0x38] sm:$0xff] }
 0x4c2   :  { %1565 = vmatpush2.bf16.msra.mxu0 %v1522_v19 }
 0x4c3   :  { %1566 = vmatprep.subr.bf16.mxu0 %v1521_v34 }
 0x4c6   :  { %1567 = vmatpush2.bf16.msra.mxu0 %v1520_v13 }
 0x4c9   :  { %1569 = vmatmul.mubr.bf16.vlgmr.msra.gmra.mxu0 %v3227_v5 }
 0x4ca   :  { %1578 = vmatprep.mubr.bf16.mxu0 %v3230_v18 }
 0x4d1   :  { %1579 = vmatmul.mubr.bf16.gmra.mxu0 %v3234_v62 }
 0x4d2   :  { %1588 = vmatprep.mubr.bf16.mxu0 %v958_v53 }
 0x4d9   :  { %1589 = vmatmul.mubr.bf16.gmra.mxu0 %v957_v42 }
 0x589   :  { %v1570_v45 = vpop.f32.mrf.mxu0 }
 0x58b   :  { %v1572_v32 = vpop.f32.mrf.mxu0 }
 0x58d   :  { %v1574_v44 = vpop.f32.mrf.mxu0 }
 0x58f   :  { %v1576_v29 = vpop.f32.mrf.mxu0 }
 0x591   :  { %v1580_v39 = vpop.f32.mrf.mxu0 }
 0x593   :  { %v1582_v40 = vpop.f32.mrf.mxu0 }
 0x595   :  { %v1584_v57 = vpop.f32.mrf.mxu0 }
 0x597   :  { %v1586_v50 = vpop.f32.mrf.mxu0 }
 0x599   :  { %v1590_v38 = vpop.f32.mrf.mxu0 }
 0x59a   :  { %1976 = vrcp.f32 %v1590_v38 }
 0x59b   :  { %v1592_v56 = vpop.f32.mrf.mxu0 }
 0x59c   :  { %1978 = vrcp.f32 %v1592_v56 }
 0x59d   :  { %v1594_v49 = vpop.f32.mrf.mxu0 }
 0x59f   :  { %v1595_v41 = vpop.f32.mrf.mxu0 }
 0x5a7   :  { %v1977_v21 = vpop.eup %1976 }
 0x5a8   :  { %v1602_v26 = vrot.slane %v1977_v21, %v3236_v8 }
 0x5a9   :  { %v1979_v1 = vpop.eup %1978 }
 0x5aa   :  { %v1607_v2 = vmul.f32 %v1602_v26, %v1570_v45  ;;  %v1609_v30 = vmul.f32 %v1602_v26, %v1574_v44  ;;  %v1611_v22 = vmul.f32 %v1602_v26, %v1580_v39  ;;  %v1613_v55 = vmul.f32 %v1602_v26, %v1584_v57 }
 0x5ab   :  { %v1606_v33 = vrot.slane %v1979_v1, %v3236_v8 }
 0x5ac   :  { %v1615_v52 = vmul.f32 %v1607_v2, %v3237_v61  ;;  %v1617_v17 = vmul.f32 %v1609_v30, %v3237_v61  ;;  %v1619_v60 = vmul.f32 %v1611_v22, %v3237_v61  ;;  %v1621_v54 = vmul.f32 %v1613_v55, %v3237_v61 }
 0x5ad   :  { %v1608_v14 = vmul.f32 %v1606_v33, %v1572_v32  ;;  %v1610_v28 = vmul.f32 %v1606_v33, %v1576_v29  ;;  %v1612_v51 = vmul.f32 %v1606_v33, %v1582_v40  ;;  %v1614_v10 = vmul.f32 %v1606_v33, %v1586_v50 }
 0x5ae   :  { %v1623_v20 = vadd.f32 %v1988_v0, %v1615_v52  ;;  %v1625_v47 = vadd.f32 %v1989_v36, %v1617_v17  ;;  %v1627_v15 = vadd.f32 %v1990_v25, %v1619_v60  ;;  %v1629_v23 = vadd.f32 %v1991_v58, %v1621_v54 }
 0x5af   :  { %v1616_v24 = vmul.f32 %v1608_v14, %v3237_v61  ;;  %v1618_v63 = vmul.f32 %v1610_v28, %v3237_v61  ;;  %v1620_v11 = vmul.f32 %v1612_v51, %v3237_v61  ;;  %v1622_v3 = vmul.f32 %v1614_v10, %v3237_v61 }
 0x5b0   :  { %1632 = vst [vmem:[#allocation6 + $0x40] sm:$0xff] %v1623_v20  ;;  %1634 = vst [vmem:[#allocation6 + $0x50] sm:$0xff] %v1625_v47 }
 0x5b1   :  { %1636 = vst [vmem:[#allocation6 + $0x60] sm:$0xff] %v1627_v15  ;;  %1638 = vst [vmem:[#allocation6 + $0x70] sm:$0xff] %v1629_v23  ;;  %v1624_v6 = vadd.f32 %v1992_v31, %v1616_v24  ;;  %v1626_v48 = vadd.f32 %v1993_v37, %v1618_v63  ;;  %v1628_v19 = vadd.f32 %v1994_v59, %v1620_v11 }
 0x5b2   :  { %v1630_v34 = vadd.f32 %v1995_v35, %v1622_v3 }
 0x5b3   :  { %1633 = vst [vmem:[#allocation6 + $0x48] sm:$0xff] %v1624_v6  ;;  %1635 = vst [vmem:[#allocation6 + $0x58] sm:$0xff] %v1626_v48 }
 0x5b4   :  { %1637 = vst [vmem:[#allocation6 + $0x68] sm:$0xff] %v1628_v19  ;;  %1639 = vst [vmem:[#allocation6 + $0x78] sm:$0xff] %v1630_v34 }
 0x5b5   :  { %2027 = shalt.err (!%p2024_p9)
}
 0x5b6   :  { %s2045_s29 = smov 256   ;;  %s2046_s30 = smov 16  }
 0x5b7   :  { %1651 = dma.vmem_to_hbm [thread:$0]  %s1646_s27, 2048, %s3061_s3, [#allocation5], %s2045_s29, %s2045_s29, %s2046_s30  }
 0x5b8   :  { %2038 = dma.done.wait [#allocation5], 2048  }
 0x5b9   :  { %2039 = vsyncadd [#allocation5], 4294965248 }
 0x5ba   :  { %1655 = vsyncpa [#allocation4], 1 }
 0x5bb   :  { %1656 = vsyncpa [#allocation5], 1 }

</bundles_post_ra>
